<compile_context>
chip_gen: v7x
topology: tpu7x:2x2x1
jax: 0.10.0
libtpu: 0.0.40
codegen_flags: <defaults>
</compile_context>

<pallas_src>
from math import sqrt

import jax
import jax.numpy as jnp
from jax.experimental import pallas as pl
from jax.experimental.pallas import tpu as pltpu

# ----------------------------- model dims ----------------------------------
B, SQ, SK = 2, 8, 8          # batch, decoder seq, encoder seq
D, H = 32, 4                 # d_model, heads
DK = D // H                  # head dim
DFF = 64                     # feed-forward hidden dim
EPS = 1e-6
RQ = B * SQ                  # flattened decoder rows (16)
RK = B * SK                  # flattened encoder rows (16)
BLANES = 128                 # lane width of the bias slab


# ----------------------------- kernel body ----------------------------------
def decoder_block_kernel(ln_ref, x_ref, enc_ref, wqk_ref, wvo_ref, w1_ref,
                         w2_ref, b_ref, hsel_ref, bok_ref, o_ref):
    f32 = jnp.float32
    x = x_ref[...]            # (RQ, D)   batch folded into rows
    enc = enc_ref[...]        # (RK, D)
    hsel = hsel_ref[...]      # (H*RQ, D) head-selection mask (0/1)
    keep = bok_ref[...] > 0.5  # (H*RQ, RK) same-batch mask

    def recip(v):
        # EUP approx seed + two Newton-Raphson steps (~f32 accurate); the
        # expensive part runs on the otherwise-idle EUP slot.
        r = pl.reciprocal(v, approx=True)
        r = r * (2.0 - v * r)
        return r * (2.0 - v * r)

    def layer_norm(v, alpha, bias):
        # torch: alpha * (x - mean) / (std + eps) + bias, std unbiased (ddof=1)
        mean = jnp.mean(v, axis=-1, keepdims=True)
        var = jnp.sum((v - mean) ** 2, axis=-1, keepdims=True) * (1.0 / (D - 1))
        return alpha * (v - mean) * recip(jnp.sqrt(var) + EPS) + bias

    def attention(q_in, kv_in, a):
        # a = 0 (self) / 1 (cross); all weight slices are lane-0 aligned and
        # 1/sqrt(dk) is already folded into the Q weights/bias at pack time.
        q = jnp.dot(q_in, wqk_ref[2 * a],
                    preferred_element_type=f32) + b_ref[2 * a:2 * a + 1, :D]
        k = jnp.dot(kv_in, wqk_ref[2 * a + 1],
                    preferred_element_type=f32) + b_ref[2 * a + 1:2 * a + 2, :D]

        # Stack heads along sublanes: row r = h*RQ + q_row.  Masking Q per
        # head block means one wide score matmul covers all heads.
        q_blk = jnp.concatenate([q] * H, axis=0) * hsel              # (H*RQ, D)
        s = jnp.einsum('rd,kd->rk', q_blk, k,
                       preferred_element_type=f32)                   # (H*RQ, RK)
        s = jnp.where(keep, s, -1e30)                                 # batch sep.
        e = jnp.exp(s - jnp.max(s, axis=-1, keepdims=True))
        p = e * recip(jnp.sum(e, axis=-1, keepdims=True))            # softmax

        # concat(heads) @ w_o  ==  sum_h p_h @ (kv_in @ (w_v_h @ w_o_h)),
        # with b_v folded into bo' at pack time (softmax rows sum to 1).
        acc = jnp.zeros((RQ, D), f32)
        for h in range(H):
            vo = jnp.dot(kv_in, wvo_ref[a, h], preferred_element_type=f32)
            acc = acc + jnp.dot(p[h * RQ:(h + 1) * RQ, :], vo,
                                preferred_element_type=f32)
        return acc + b_ref[4 + a:5 + a, :D]                           # bo'

    # ---- residual 0: self-attention (pre-norm) -----------------------------
    n0 = layer_norm(x, ln_ref[0], ln_ref[1])
    x = x + attention(n0, n0, 0)

    # ---- residual 1: cross-attention (pre-norm; K/V from encoder output) ---
    n1 = layer_norm(x, ln_ref[2], ln_ref[3])
    x = x + attention(n1, enc, 1)

    # ---- residual 2: feed-forward (pre-norm) --------------------------------
    n2 = layer_norm(x, ln_ref[4], ln_ref[5])
    h1 = jnp.maximum(jnp.dot(n2, w1_ref[...], preferred_element_type=f32)
                     + b_ref[6:7, :DFF], 0.0)
    x = x + jnp.dot(h1, w2_ref[...], preferred_element_type=f32) + b_ref[7:8, :D]

    o_ref[...] = x.astype(o_ref.dtype)


# ----------------------------- one-time packing ------------------------------
def pack_params(ln_params, self_w, cross_w, ffn_w):
    """Runs ONCE at weight-load time (outside jit): lane-aligned slabs + folds."""
    s_wq, s_bq, s_wk, s_bk, s_wv, s_bv, s_wo, s_bo = self_w
    c_wq, c_bq, c_wk, c_bk, c_wv, c_bv, c_wo, c_bo = cross_w
    f_w1, f_b1, f_w2, f_b2 = ffn_w
    scale = 1.0 / sqrt(DK)

    # Q/K projection weights, 1/sqrt(dk) folded into Q.       (4, D, D)
    wqk = jnp.stack([s_wq * scale, s_wk, c_wq * scale, c_wk])

    # Per-head fused value/output weights: w_v_h @ w_o_h.      (2, H, D, D)
    def fuse_vo(wv, wo):
        return jnp.stack([wv[:, h * DK:(h + 1) * DK] @ wo[h * DK:(h + 1) * DK, :]
                          for h in range(H)])
    wvo = jnp.stack([fuse_vo(s_wv, s_wo), fuse_vo(c_wv, c_wo)])

    # Bias slab: one lane-0-aligned row per segment.           (8, 128)
    def row(v):
        return jnp.pad(v, (0, BLANES - v.shape[0]))
    b_slab = jnp.stack([
        row(s_bq * scale), row(s_bk), row(c_bq * scale), row(c_bk),
        row(s_bo + s_bv @ s_wo),            # self bo' (b_v folded through w_o)
        row(c_bo + c_bv @ c_wo),            # cross bo'
        row(f_b1), row(f_b2)])

    # Precomputed masks (stacked-head layout: row r = h*RQ + q).
    r = jnp.arange(H * RQ)
    hsel = (jnp.arange(D)[None, :] // DK == (r // RQ)[:, None]).astype(jnp.float32)
    bok = (((r % RQ) // SQ)[:, None] ==
           (jnp.arange(RK) // SK)[None, :]).astype(jnp.float32)

    return dict(ln=ln_params.reshape(-1).astype(jnp.float32),     # (6,) SMEM
                wqk=wqk, wvo=wvo, w1=f_w1, w2=f_w2, b=b_slab,
                hsel=hsel, bok=bok)


# ----------------------------- wrapper ---------------------------------------
@jax.jit
def decoder_block(x, encoder_output, packed):
    x2d = x.reshape(RQ, D)                 # free contiguous reshapes
    enc2d = encoder_output.reshape(RK, D)

    smem = pl.BlockSpec(memory_space=pltpu.MemorySpace.SMEM)
    vmem = pl.BlockSpec(memory_space=pltpu.MemorySpace.VMEM)

    out2d = pl.pallas_call(
        decoder_block_kernel,
        out_shape=jax.ShapeDtypeStruct((RQ, D), jnp.float32),
        in_specs=[smem] + [vmem] * 9,
        out_specs=vmem,
    )(packed['ln'], x2d, enc2d, packed['wqk'], packed['wvo'],
      packed['w1'], packed['w2'], packed['b'], packed['hsel'], packed['bok'])

    return out2d.reshape(B, SQ, D)


# ----------------------------- pure-JAX reference ----------------------------
def _ref_layer_norm(v, alpha, bias):
    mean = jnp.mean(v, axis=-1, keepdims=True)
    var = jnp.sum((v - mean) ** 2, axis=-1, keepdims=True) / (v.shape[-1] - 1)
    return alpha * (v - mean) / (jnp.sqrt(var) + EPS) + bias


def _ref_mha(q_in, kv_in, w):
    wq, bq, wk, bk, wv, bv, wo, bo = w
    q = q_in @ wq + bq
    k = kv_in @ wk + bk
    v = kv_in @ wv + bv
    q = q.reshape(q.shape[0], H, DK).transpose(1, 0, 2)
    k = k.reshape(k.shape[0], H, DK).transpose(1, 0, 2)
    v = v.reshape(v.shape[0], H, DK).transpose(1, 0, 2)
    s = jnp.einsum("hqd,hkd->hqk", q, k) / sqrt(DK)
    p = jax.nn.softmax(s, axis=-1)
    o = jnp.einsum("hqk,hkd->hqd", p, v).transpose(1, 0, 2).reshape(q_in.shape[0], D)
    return o @ wo + bo


def decoder_block_ref(x, enc, ln_params, self_w, cross_w, ffn_w):
    outs = []
    for b in range(B):
        xb, eb = x[b], enc[b]
        n0 = _ref_layer_norm(xb, ln_params[0, 0], ln_params[0, 1])
        xb = xb + _ref_mha(n0, n0, self_w)
        n1 = _ref_layer_norm(xb, ln_params[1, 0], ln_params[1, 1])
        xb = xb + _ref_mha(n1, eb, cross_w)
        n2 = _ref_layer_norm(xb, ln_params[2, 0], ln_params[2, 1])
        w1, b1, w2, b2 = ffn_w
        xb = xb + (jnp.maximum(n2 @ w1 + b1, 0.0) @ w2 + b2)
        outs.append(xb)
    return jnp.stack(outs)


# ----------------------------- main -------------------------------------------
if __name__ == "__main__":
    key = jax.random.PRNGKey(0)
    keys = jax.random.split(key, 24)

    def init(k, shape, scale=0.1):
        return (scale * jax.random.normal(k, shape)).astype(jnp.float32)

    x = init(keys[0], (B, SQ, D), 1.0)
    encoder_output = init(keys[1], (B, SK, D), 1.0)
    # masks exist in the reference API but have no forward effect (see notes)
    src_mask = jnp.ones((B, 1, SQ, SK), jnp.float32)
    tgt_mask = jnp.ones((B, 1, SQ, SQ), jnp.float32)
    del src_mask, tgt_mask

    # LayerNorm params: torch init alpha=1, bias=0 (scalar each), 3 norms.
    ln_params = jnp.stack([jnp.array([1.0, 0.0], jnp.float32)] * 3)   # (3, 2)

    def attn_weights(ks):
        return (
            init(ks[0], (D, D)), init(ks[1], (D,)),   # w_q (in,out layout), b_q
            init(ks[2], (D, D)), init(ks[3], (D,)),   # w_k, b_k
            init(ks[4], (D, D)), init(ks[5], (D,)),   # w_v, b_v
            init(ks[6], (D, D)), init(ks[7], (D,)),   # w_o, b_o
        )

    self_w = attn_weights(keys[2:10])
    cross_w = attn_weights(keys[10:18])
    ffn_w = (
        init(keys[18], (D, DFF)), init(keys[19], (DFF,)),   # linear_1
        init(keys[20], (DFF, D)), init(keys[21], (D,)),     # linear_2
    )

    # Pack once at "weight-load time" (outside the jitted per-call path).
    packed = pack_params(ln_params, self_w, cross_w, ffn_w)
    packed = jax.tree_util.tree_map(jax.block_until_ready, packed)

    out = decoder_block(x, encoder_output, packed)
    out = jax.block_until_ready(out)

    ref = decoder_block_ref(x, encoder_output, ln_params, self_w, cross_w, ffn_w)
    assert out.shape == (B, SQ, D)
    assert jnp.allclose(out, ref, atol=1e-4, rtol=1e-4), "mismatch vs reference"

    print("KERNEL_OK")
</pallas_src>

<mosaic_0001>
module attributes {stable_mosaic.version = 11 : i64} {
  func.func @decoder_block_kernel(%arg0: memref<6xf32, #tpu.memory_space<smem>>, %arg1: memref<16x32xf32, #tpu.memory_space<vmem>>, %arg2: memref<16x32xf32, #tpu.memory_space<vmem>>, %arg3: memref<4x32x32xf32, #tpu.memory_space<vmem>>, %arg4: memref<2x4x32x32xf32, #tpu.memory_space<vmem>>, %arg5: memref<32x64xf32, #tpu.memory_space<vmem>>, %arg6: memref<64x32xf32, #tpu.memory_space<vmem>>, %arg7: memref<8x128xf32, #tpu.memory_space<vmem>>, %arg8: memref<64x32xf32, #tpu.memory_space<vmem>>, %arg9: memref<64x16xf32, #tpu.memory_space<vmem>>, %arg10: memref<16x32xf32, #tpu.memory_space<vmem>>) attributes {dimension_semantics = [], scalar_prefetch = 0 : i64, scratch_operands = 0 : i64, tpu.core_type = #tpu.core_type<tc>} {
    %c0 = arith.constant 0 : index
    %c0_0 = arith.constant 0 : index
    %0 = vector.load %arg1[%c0, %c0_0] : memref<16x32xf32, #tpu.memory_space<vmem>>, vector<16x32xf32>
    %c0_1 = arith.constant 0 : index
    %c0_2 = arith.constant 0 : index
    %1 = vector.load %arg2[%c0_1, %c0_2] : memref<16x32xf32, #tpu.memory_space<vmem>>, vector<16x32xf32>
    %c0_3 = arith.constant 0 : index
    %c0_4 = arith.constant 0 : index
    %2 = vector.load %arg8[%c0_3, %c0_4] : memref<64x32xf32, #tpu.memory_space<vmem>>, vector<64x32xf32>
    %c0_5 = arith.constant 0 : index
    %c0_6 = arith.constant 0 : index
    %3 = vector.load %arg9[%c0_5, %c0_6] : memref<64x16xf32, #tpu.memory_space<vmem>>, vector<64x16xf32>
    %cst = arith.constant 5.000000e-01 : f32
    %4 = vector.broadcast %cst : f32 to vector<64x16xf32>
    %5 = arith.cmpf ogt, %3, %4 : vector<64x16xf32>
    %c0_7 = arith.constant 0 : index
    %6 = memref.load %arg0[%c0_7] : memref<6xf32, #tpu.memory_space<smem>>
    %c1 = arith.constant 1 : index
    %7 = memref.load %arg0[%c1] : memref<6xf32, #tpu.memory_space<smem>>
    %cst_8 = arith.constant dense<0.000000e+00> : vector<16xf32>
    %8 = vector.multi_reduction <add>, %0, %cst_8 [1] : vector<16x32xf32> to vector<16xf32>
    %9 = vector.shape_cast %8 : vector<16xf32> to vector<16x1xf32>
    %cst_9 = arith.constant 3.200000e+01 : f32
    %10 = vector.broadcast %cst_9 : f32 to vector<16x1xf32>
    %11 = arith.divf %9, %10 : vector<16x1xf32>
    %12 = vector.broadcast %11 : vector<16x1xf32> to vector<16x32xf32>
    %13 = arith.subf %0, %12 : vector<16x32xf32>
    %14 = arith.mulf %13, %13 : vector<16x32xf32>
    %cst_10 = arith.constant dense<0.000000e+00> : vector<16xf32>
    %15 = vector.multi_reduction <add>, %14, %cst_10 [1] : vector<16x32xf32> to vector<16xf32>
    %16 = vector.shape_cast %15 : vector<16xf32> to vector<16x1xf32>
    %cst_11 = arith.constant 0.0322580636 : f32
    %17 = vector.broadcast %cst_11 : f32 to vector<16x1xf32>
    %18 = arith.mulf %16, %17 : vector<16x1xf32>
    %19 = vector.broadcast %11 : vector<16x1xf32> to vector<16x32xf32>
    %20 = arith.subf %0, %19 : vector<16x32xf32>
    %21 = vector.broadcast %6 : f32 to vector<16x32xf32>
    %22 = arith.mulf %21, %20 : vector<16x32xf32>
    %23 = math.sqrt %18 : vector<16x1xf32>
    %cst_12 = arith.constant 9.99999997E-7 : f32
    %24 = vector.broadcast %cst_12 : f32 to vector<16x1xf32>
    %25 = arith.addf %23, %24 : vector<16x1xf32>
    %26 = tpu.reciprocal %25 {approx = true} : vector<16x1xf32> -> vector<16x1xf32>
    %27 = arith.mulf %25, %26 : vector<16x1xf32>
    %cst_13 = arith.constant 2.000000e+00 : f32
    %28 = vector.broadcast %cst_13 : f32 to vector<16x1xf32>
    %29 = arith.subf %28, %27 : vector<16x1xf32>
    %30 = arith.mulf %26, %29 : vector<16x1xf32>
    %31 = arith.mulf %25, %30 : vector<16x1xf32>
    %cst_14 = arith.constant 2.000000e+00 : f32
    %32 = vector.broadcast %cst_14 : f32 to vector<16x1xf32>
    %33 = arith.subf %32, %31 : vector<16x1xf32>
    %34 = arith.mulf %30, %33 : vector<16x1xf32>
    %35 = vector.broadcast %34 : vector<16x1xf32> to vector<16x32xf32>
    %36 = arith.mulf %22, %35 : vector<16x32xf32>
    %37 = vector.broadcast %7 : f32 to vector<16x32xf32>
    %38 = arith.addf %36, %37 : vector<16x32xf32>
    %c0_15 = arith.constant 0 : index
    %c0_16 = arith.constant 0 : index
    %c0_17 = arith.constant 0 : index
    %39 = vector.load %arg3[%c0_15, %c0_16, %c0_17] : memref<4x32x32xf32, #tpu.memory_space<vmem>>, vector<1x32x32xf32>
    %40 = vector.shape_cast %39 : vector<1x32x32xf32> to vector<32x32xf32>
    %cst_18 = arith.constant dense<0.000000e+00> : vector<16x32xf32>
    %41 = tpu.matmul %38, %40, %cst_18 {dimension_numbers = #tpu.dot_dimension_numbers<[1], [0], [0], [1], [0, 0, 1, 1], [], []>} : vector<16x32xf32>, vector<32x32xf32>, vector<16x32xf32> -> vector<16x32xf32>
    %c0_19 = arith.constant 0 : index
    %c0_20 = arith.constant 0 : index
    %42 = vector.load %arg7[%c0_19, %c0_20] : memref<8x128xf32, #tpu.memory_space<vmem>>, vector<1x32xf32>
    %43 = vector.broadcast %42 : vector<1x32xf32> to vector<16x32xf32>
    %44 = arith.addf %41, %43 : vector<16x32xf32>
    %c1_21 = arith.constant 1 : index
    %c0_22 = arith.constant 0 : index
    %c0_23 = arith.constant 0 : index
    %45 = vector.load %arg3[%c1_21, %c0_22, %c0_23] : memref<4x32x32xf32, #tpu.memory_space<vmem>>, vector<1x32x32xf32>
    %46 = vector.shape_cast %45 : vector<1x32x32xf32> to vector<32x32xf32>
    %cst_24 = arith.constant dense<0.000000e+00> : vector<16x32xf32>
    %47 = tpu.matmul %38, %46, %cst_24 {dimension_numbers = #tpu.dot_dimension_numbers<[1], [0], [0], [1], [0, 0, 1, 1], [], []>} : vector<16x32xf32>, vector<32x32xf32>, vector<16x32xf32> -> vector<16x32xf32>
    %c1_25 = arith.constant 1 : index
    %c0_26 = arith.constant 0 : index
    %48 = vector.load %arg7[%c1_25, %c0_26] : memref<8x128xf32, #tpu.memory_space<vmem>>, vector<1x32xf32>
    %49 = vector.broadcast %48 : vector<1x32xf32> to vector<16x32xf32>
    %50 = arith.addf %47, %49 : vector<16x32xf32>
    %51 = tpu.concatenate %44, %44, %44, %44 in 0 : vector<16x32xf32>, vector<16x32xf32>, vector<16x32xf32>, vector<16x32xf32> -> vector<64x32xf32>
    %52 = arith.mulf %51, %2 : vector<64x32xf32>
    "tpu.trace_start"() <{level = 10 : i32, message = "rd,kd->rk"}> : () -> ()
    %cst_27 = arith.constant dense<0.000000e+00> : vector<64x16xf32>
    %53 = tpu.matmul %52, %50, %cst_27 {dimension_numbers = #tpu.dot_dimension_numbers<[1], [1], [0], [0], [0, 0, 1, 0], [], []>} : vector<64x32xf32>, vector<16x32xf32>, vector<64x16xf32> -> vector<64x16xf32>
    %cst_28 = arith.constant -1.000000e+30 : f32
    "tpu.trace_stop"() : () -> ()
    %54 = vector.broadcast %cst_28 : f32 to vector<64x16xf32>
    %55 = arith.select %5, %53, %54 : vector<64x16xi1>, vector<64x16xf32>
    %cst_29 = arith.constant dense<0xFF800000> : vector<64xf32>
    %56 = vector.multi_reduction <maximumf>, %55, %cst_29 [1] : vector<64x16xf32> to vector<64xf32>
    %57 = vector.shape_cast %56 : vector<64xf32> to vector<64x1xf32>
    %58 = vector.broadcast %57 : vector<64x1xf32> to vector<64x16xf32>
    %59 = arith.subf %55, %58 : vector<64x16xf32>
    %60 = math.exp %59 : vector<64x16xf32>
    %cst_30 = arith.constant dense<0.000000e+00> : vector<64xf32>
    %61 = vector.multi_reduction <add>, %60, %cst_30 [1] : vector<64x16xf32> to vector<64xf32>
    %62 = vector.shape_cast %61 : vector<64xf32> to vector<64x1xf32>
    %63 = tpu.reciprocal %62 {approx = true} : vector<64x1xf32> -> vector<64x1xf32>
    %64 = arith.mulf %62, %63 : vector<64x1xf32>
    %cst_31 = arith.constant 2.000000e+00 : f32
    %65 = vector.broadcast %cst_31 : f32 to vector<64x1xf32>
    %66 = arith.subf %65, %64 : vector<64x1xf32>
    %67 = arith.mulf %63, %66 : vector<64x1xf32>
    %68 = arith.mulf %62, %67 : vector<64x1xf32>
    %cst_32 = arith.constant 2.000000e+00 : f32
    %69 = vector.broadcast %cst_32 : f32 to vector<64x1xf32>
    %70 = arith.subf %69, %68 : vector<64x1xf32>
    %71 = arith.mulf %67, %70 : vector<64x1xf32>
    %72 = vector.broadcast %71 : vector<64x1xf32> to vector<64x16xf32>
    %73 = arith.mulf %60, %72 : vector<64x16xf32>
    %cst_33 = arith.constant 0.000000e+00 : f32
    %74 = vector.broadcast %cst_33 : f32 to vector<16x32xf32>
    %c0_34 = arith.constant 0 : index
    %c0_35 = arith.constant 0 : index
    %c0_36 = arith.constant 0 : index
    %c0_37 = arith.constant 0 : index
    %75 = vector.load %arg4[%c0_34, %c0_35, %c0_36, %c0_37] : memref<2x4x32x32xf32, #tpu.memory_space<vmem>>, vector<1x1x32x32xf32>
    %76 = vector.shape_cast %75 : vector<1x1x32x32xf32> to vector<32x32xf32>
    %cst_38 = arith.constant dense<0.000000e+00> : vector<16x32xf32>
    %77 = tpu.matmul %38, %76, %cst_38 {dimension_numbers = #tpu.dot_dimension_numbers<[1], [0], [0], [1], [0, 0, 1, 1], [], []>} : vector<16x32xf32>, vector<32x32xf32>, vector<16x32xf32> -> vector<16x32xf32>
    %78 = vector.extract_strided_slice %73 {offsets = [0, 0], sizes = [16, 16], strides = [1, 1]} : vector<64x16xf32> to vector<16x16xf32>
    %cst_39 = arith.constant dense<0.000000e+00> : vector<16x32xf32>
    %79 = tpu.matmul %78, %77, %cst_39 {dimension_numbers = #tpu.dot_dimension_numbers<[1], [0], [0], [1], [0, 0, 1, 1], [], []>} : vector<16x16xf32>, vector<16x32xf32>, vector<16x32xf32> -> vector<16x32xf32>
    %80 = arith.addf %74, %79 : vector<16x32xf32>
    %c0_40 = arith.constant 0 : index
    %c1_41 = arith.constant 1 : index
    %c0_42 = arith.constant 0 : index
    %c0_43 = arith.constant 0 : index
    %81 = vector.load %arg4[%c0_40, %c1_41, %c0_42, %c0_43] : memref<2x4x32x32xf32, #tpu.memory_space<vmem>>, vector<1x1x32x32xf32>
    %82 = vector.shape_cast %81 : vector<1x1x32x32xf32> to vector<32x32xf32>
    %cst_44 = arith.constant dense<0.000000e+00> : vector<16x32xf32>
    %83 = tpu.matmul %38, %82, %cst_44 {dimension_numbers = #tpu.dot_dimension_numbers<[1], [0], [0], [1], [0, 0, 1, 1], [], []>} : vector<16x32xf32>, vector<32x32xf32>, vector<16x32xf32> -> vector<16x32xf32>
    %84 = vector.extract_strided_slice %73 {offsets = [16, 0], sizes = [16, 16], strides = [1, 1]} : vector<64x16xf32> to vector<16x16xf32>
    %cst_45 = arith.constant dense<0.000000e+00> : vector<16x32xf32>
    %85 = tpu.matmul %84, %83, %cst_45 {dimension_numbers = #tpu.dot_dimension_numbers<[1], [0], [0], [1], [0, 0, 1, 1], [], []>} : vector<16x16xf32>, vector<16x32xf32>, vector<16x32xf32> -> vector<16x32xf32>
    %86 = arith.addf %80, %85 : vector<16x32xf32>
    %c0_46 = arith.constant 0 : index
    %c2 = arith.constant 2 : index
    %c0_47 = arith.constant 0 : index
    %c0_48 = arith.constant 0 : index
    %87 = vector.load %arg4[%c0_46, %c2, %c0_47, %c0_48] : memref<2x4x32x32xf32, #tpu.memory_space<vmem>>, vector<1x1x32x32xf32>
    %88 = vector.shape_cast %87 : vector<1x1x32x32xf32> to vector<32x32xf32>
    %cst_49 = arith.constant dense<0.000000e+00> : vector<16x32xf32>
    %89 = tpu.matmul %38, %88, %cst_49 {dimension_numbers = #tpu.dot_dimension_numbers<[1], [0], [0], [1], [0, 0, 1, 1], [], []>} : vector<16x32xf32>, vector<32x32xf32>, vector<16x32xf32> -> vector<16x32xf32>
    %90 = vector.extract_strided_slice %73 {offsets = [32, 0], sizes = [16, 16], strides = [1, 1]} : vector<64x16xf32> to vector<16x16xf32>
    %cst_50 = arith.constant dense<0.000000e+00> : vector<16x32xf32>
    %91 = tpu.matmul %90, %89, %cst_50 {dimension_numbers = #tpu.dot_dimension_numbers<[1], [0], [0], [1], [0, 0, 1, 1], [], []>} : vector<16x16xf32>, vector<16x32xf32>, vector<16x32xf32> -> vector<16x32xf32>
    %92 = arith.addf %86, %91 : vector<16x32xf32>
    %c0_51 = arith.constant 0 : index
    %c3 = arith.constant 3 : index
    %c0_52 = arith.constant 0 : index
    %c0_53 = arith.constant 0 : index
    %93 = vector.load %arg4[%c0_51, %c3, %c0_52, %c0_53] : memref<2x4x32x32xf32, #tpu.memory_space<vmem>>, vector<1x1x32x32xf32>
    %94 = vector.shape_cast %93 : vector<1x1x32x32xf32> to vector<32x32xf32>
    %cst_54 = arith.constant dense<0.000000e+00> : vector<16x32xf32>
    %95 = tpu.matmul %38, %94, %cst_54 {dimension_numbers = #tpu.dot_dimension_numbers<[1], [0], [0], [1], [0, 0, 1, 1], [], []>} : vector<16x32xf32>, vector<32x32xf32>, vector<16x32xf32> -> vector<16x32xf32>
    %96 = vector.extract_strided_slice %73 {offsets = [48, 0], sizes = [16, 16], strides = [1, 1]} : vector<64x16xf32> to vector<16x16xf32>
    %cst_55 = arith.constant dense<0.000000e+00> : vector<16x32xf32>
    %97 = tpu.matmul %96, %95, %cst_55 {dimension_numbers = #tpu.dot_dimension_numbers<[1], [0], [0], [1], [0, 0, 1, 1], [], []>} : vector<16x16xf32>, vector<16x32xf32>, vector<16x32xf32> -> vector<16x32xf32>
    %98 = arith.addf %92, %97 : vector<16x32xf32>
    %c4 = arith.constant 4 : index
    %c0_56 = arith.constant 0 : index
    %99 = vector.load %arg7[%c4, %c0_56] : memref<8x128xf32, #tpu.memory_space<vmem>>, vector<1x32xf32>
    %100 = vector.broadcast %99 : vector<1x32xf32> to vector<16x32xf32>
    %101 = arith.addf %98, %100 : vector<16x32xf32>
    %102 = arith.addf %0, %101 : vector<16x32xf32>
    %c2_57 = arith.constant 2 : index
    %103 = memref.load %arg0[%c2_57] : memref<6xf32, #tpu.memory_space<smem>>
    %c3_58 = arith.constant 3 : index
    %104 = memref.load %arg0[%c3_58] : memref<6xf32, #tpu.memory_space<smem>>
    %cst_59 = arith.constant dense<0.000000e+00> : vector<16xf32>
    %105 = vector.multi_reduction <add>, %102, %cst_59 [1] : vector<16x32xf32> to vector<16xf32>
    %106 = vector.shape_cast %105 : vector<16xf32> to vector<16x1xf32>
    %cst_60 = arith.constant 3.200000e+01 : f32
    %107 = vector.broadcast %cst_60 : f32 to vector<16x1xf32>
    %108 = arith.divf %106, %107 : vector<16x1xf32>
    %109 = vector.broadcast %108 : vector<16x1xf32> to vector<16x32xf32>
    %110 = arith.subf %102, %109 : vector<16x32xf32>
    %111 = arith.mulf %110, %110 : vector<16x32xf32>
    %cst_61 = arith.constant dense<0.000000e+00> : vector<16xf32>
    %112 = vector.multi_reduction <add>, %111, %cst_61 [1] : vector<16x32xf32> to vector<16xf32>
    %113 = vector.shape_cast %112 : vector<16xf32> to vector<16x1xf32>
    %cst_62 = arith.constant 0.0322580636 : f32
    %114 = vector.broadcast %cst_62 : f32 to vector<16x1xf32>
    %115 = arith.mulf %113, %114 : vector<16x1xf32>
    %116 = vector.broadcast %108 : vector<16x1xf32> to vector<16x32xf32>
    %117 = arith.subf %102, %116 : vector<16x32xf32>
    %118 = vector.broadcast %103 : f32 to vector<16x32xf32>
    %119 = arith.mulf %118, %117 : vector<16x32xf32>
    %120 = math.sqrt %115 : vector<16x1xf32>
    %cst_63 = arith.constant 9.99999997E-7 : f32
    %121 = vector.broadcast %cst_63 : f32 to vector<16x1xf32>
    %122 = arith.addf %120, %121 : vector<16x1xf32>
    %123 = tpu.reciprocal %122 {approx = true} : vector<16x1xf32> -> vector<16x1xf32>
    %124 = arith.mulf %122, %123 : vector<16x1xf32>
    %cst_64 = arith.constant 2.000000e+00 : f32
    %125 = vector.broadcast %cst_64 : f32 to vector<16x1xf32>
    %126 = arith.subf %125, %124 : vector<16x1xf32>
    %127 = arith.mulf %123, %126 : vector<16x1xf32>
    %128 = arith.mulf %122, %127 : vector<16x1xf32>
    %cst_65 = arith.constant 2.000000e+00 : f32
    %129 = vector.broadcast %cst_65 : f32 to vector<16x1xf32>
    %130 = arith.subf %129, %128 : vector<16x1xf32>
    %131 = arith.mulf %127, %130 : vector<16x1xf32>
    %132 = vector.broadcast %131 : vector<16x1xf32> to vector<16x32xf32>
    %133 = arith.mulf %119, %132 : vector<16x32xf32>
    %134 = vector.broadcast %104 : f32 to vector<16x32xf32>
    %135 = arith.addf %133, %134 : vector<16x32xf32>
    %c2_66 = arith.constant 2 : index
    %c0_67 = arith.constant 0 : index
    %c0_68 = arith.constant 0 : index
    %136 = vector.load %arg3[%c2_66, %c0_67, %c0_68] : memref<4x32x32xf32, #tpu.memory_space<vmem>>, vector<1x32x32xf32>
    %137 = vector.shape_cast %136 : vector<1x32x32xf32> to vector<32x32xf32>
    %cst_69 = arith.constant dense<0.000000e+00> : vector<16x32xf32>
    %138 = tpu.matmul %135, %137, %cst_69 {dimension_numbers = #tpu.dot_dimension_numbers<[1], [0], [0], [1], [0, 0, 1, 1], [], []>} : vector<16x32xf32>, vector<32x32xf32>, vector<16x32xf32> -> vector<16x32xf32>
    %c2_70 = arith.constant 2 : index
    %c0_71 = arith.constant 0 : index
    %139 = vector.load %arg7[%c2_70, %c0_71] : memref<8x128xf32, #tpu.memory_space<vmem>>, vector<1x32xf32>
    %140 = vector.broadcast %139 : vector<1x32xf32> to vector<16x32xf32>
    %141 = arith.addf %138, %140 : vector<16x32xf32>
    %c3_72 = arith.constant 3 : index
    %c0_73 = arith.constant 0 : index
    %c0_74 = arith.constant 0 : index
    %142 = vector.load %arg3[%c3_72, %c0_73, %c0_74] : memref<4x32x32xf32, #tpu.memory_space<vmem>>, vector<1x32x32xf32>
    %143 = vector.shape_cast %142 : vector<1x32x32xf32> to vector<32x32xf32>
    %cst_75 = arith.constant dense<0.000000e+00> : vector<16x32xf32>
    %144 = tpu.matmul %1, %143, %cst_75 {dimension_numbers = #tpu.dot_dimension_numbers<[1], [0], [0], [1], [0, 0, 1, 1], [], []>} : vector<16x32xf32>, vector<32x32xf32>, vector<16x32xf32> -> vector<16x32xf32>
    %c3_76 = arith.constant 3 : index
    %c0_77 = arith.constant 0 : index
    %145 = vector.load %arg7[%c3_76, %c0_77] : memref<8x128xf32, #tpu.memory_space<vmem>>, vector<1x32xf32>
    %146 = vector.broadcast %145 : vector<1x32xf32> to vector<16x32xf32>
    %147 = arith.addf %144, %146 : vector<16x32xf32>
    %148 = tpu.concatenate %141, %141, %141, %141 in 0 : vector<16x32xf32>, vector<16x32xf32>, vector<16x32xf32>, vector<16x32xf32> -> vector<64x32xf32>
    %149 = arith.mulf %148, %2 : vector<64x32xf32>
    "tpu.trace_start"() <{level = 10 : i32, message = "rd,kd->rk"}> : () -> ()
    %cst_78 = arith.constant dense<0.000000e+00> : vector<64x16xf32>
    %150 = tpu.matmul %149, %147, %cst_78 {dimension_numbers = #tpu.dot_dimension_numbers<[1], [1], [0], [0], [0, 0, 1, 0], [], []>} : vector<64x32xf32>, vector<16x32xf32>, vector<64x16xf32> -> vector<64x16xf32>
    %cst_79 = arith.constant -1.000000e+30 : f32
    "tpu.trace_stop"() : () -> ()
    %151 = vector.broadcast %cst_79 : f32 to vector<64x16xf32>
    %152 = arith.select %5, %150, %151 : vector<64x16xi1>, vector<64x16xf32>
    %cst_80 = arith.constant dense<0xFF800000> : vector<64xf32>
    %153 = vector.multi_reduction <maximumf>, %152, %cst_80 [1] : vector<64x16xf32> to vector<64xf32>
    %154 = vector.shape_cast %153 : vector<64xf32> to vector<64x1xf32>
    %155 = vector.broadcast %154 : vector<64x1xf32> to vector<64x16xf32>
    %156 = arith.subf %152, %155 : vector<64x16xf32>
    %157 = math.exp %156 : vector<64x16xf32>
    %cst_81 = arith.constant dense<0.000000e+00> : vector<64xf32>
    %158 = vector.multi_reduction <add>, %157, %cst_81 [1] : vector<64x16xf32> to vector<64xf32>
    %159 = vector.shape_cast %158 : vector<64xf32> to vector<64x1xf32>
    %160 = tpu.reciprocal %159 {approx = true} : vector<64x1xf32> -> vector<64x1xf32>
    %161 = arith.mulf %159, %160 : vector<64x1xf32>
    %cst_82 = arith.constant 2.000000e+00 : f32
    %162 = vector.broadcast %cst_82 : f32 to vector<64x1xf32>
    %163 = arith.subf %162, %161 : vector<64x1xf32>
    %164 = arith.mulf %160, %163 : vector<64x1xf32>
    %165 = arith.mulf %159, %164 : vector<64x1xf32>
    %cst_83 = arith.constant 2.000000e+00 : f32
    %166 = vector.broadcast %cst_83 : f32 to vector<64x1xf32>
    %167 = arith.subf %166, %165 : vector<64x1xf32>
    %168 = arith.mulf %164, %167 : vector<64x1xf32>
    %169 = vector.broadcast %168 : vector<64x1xf32> to vector<64x16xf32>
    %170 = arith.mulf %157, %169 : vector<64x16xf32>
    %cst_84 = arith.constant 0.000000e+00 : f32
    %171 = vector.broadcast %cst_84 : f32 to vector<16x32xf32>
    %c1_85 = arith.constant 1 : index
    %c0_86 = arith.constant 0 : index
    %c0_87 = arith.constant 0 : index
    %c0_88 = arith.constant 0 : index
    %172 = vector.load %arg4[%c1_85, %c0_86, %c0_87, %c0_88] : memref<2x4x32x32xf32, #tpu.memory_space<vmem>>, vector<1x1x32x32xf32>
    %173 = vector.shape_cast %172 : vector<1x1x32x32xf32> to vector<32x32xf32>
    %cst_89 = arith.constant dense<0.000000e+00> : vector<16x32xf32>
    %174 = tpu.matmul %1, %173, %cst_89 {dimension_numbers = #tpu.dot_dimension_numbers<[1], [0], [0], [1], [0, 0, 1, 1], [], []>} : vector<16x32xf32>, vector<32x32xf32>, vector<16x32xf32> -> vector<16x32xf32>
    %175 = vector.extract_strided_slice %170 {offsets = [0, 0], sizes = [16, 16], strides = [1, 1]} : vector<64x16xf32> to vector<16x16xf32>
    %cst_90 = arith.constant dense<0.000000e+00> : vector<16x32xf32>
    %176 = tpu.matmul %175, %174, %cst_90 {dimension_numbers = #tpu.dot_dimension_numbers<[1], [0], [0], [1], [0, 0, 1, 1], [], []>} : vector<16x16xf32>, vector<16x32xf32>, vector<16x32xf32> -> vector<16x32xf32>
    %177 = arith.addf %171, %176 : vector<16x32xf32>
    %c1_91 = arith.constant 1 : index
    %c1_92 = arith.constant 1 : index
    %c0_93 = arith.constant 0 : index
    %c0_94 = arith.constant 0 : index
    %178 = vector.load %arg4[%c1_91, %c1_92, %c0_93, %c0_94] : memref<2x4x32x32xf32, #tpu.memory_space<vmem>>, vector<1x1x32x32xf32>
    %179 = vector.shape_cast %178 : vector<1x1x32x32xf32> to vector<32x32xf32>
    %cst_95 = arith.constant dense<0.000000e+00> : vector<16x32xf32>
    %180 = tpu.matmul %1, %179, %cst_95 {dimension_numbers = #tpu.dot_dimension_numbers<[1], [0], [0], [1], [0, 0, 1, 1], [], []>} : vector<16x32xf32>, vector<32x32xf32>, vector<16x32xf32> -> vector<16x32xf32>
    %181 = vector.extract_strided_slice %170 {offsets = [16, 0], sizes = [16, 16], strides = [1, 1]} : vector<64x16xf32> to vector<16x16xf32>
    %cst_96 = arith.constant dense<0.000000e+00> : vector<16x32xf32>
    %182 = tpu.matmul %181, %180, %cst_96 {dimension_numbers = #tpu.dot_dimension_numbers<[1], [0], [0], [1], [0, 0, 1, 1], [], []>} : vector<16x16xf32>, vector<16x32xf32>, vector<16x32xf32> -> vector<16x32xf32>
    %183 = arith.addf %177, %182 : vector<16x32xf32>
    %c1_97 = arith.constant 1 : index
    %c2_98 = arith.constant 2 : index
    %c0_99 = arith.constant 0 : index
    %c0_100 = arith.constant 0 : index
    %184 = vector.load %arg4[%c1_97, %c2_98, %c0_99, %c0_100] : memref<2x4x32x32xf32, #tpu.memory_space<vmem>>, vector<1x1x32x32xf32>
    %185 = vector.shape_cast %184 : vector<1x1x32x32xf32> to vector<32x32xf32>
    %cst_101 = arith.constant dense<0.000000e+00> : vector<16x32xf32>
    %186 = tpu.matmul %1, %185, %cst_101 {dimension_numbers = #tpu.dot_dimension_numbers<[1], [0], [0], [1], [0, 0, 1, 1], [], []>} : vector<16x32xf32>, vector<32x32xf32>, vector<16x32xf32> -> vector<16x32xf32>
    %187 = vector.extract_strided_slice %170 {offsets = [32, 0], sizes = [16, 16], strides = [1, 1]} : vector<64x16xf32> to vector<16x16xf32>
    %cst_102 = arith.constant dense<0.000000e+00> : vector<16x32xf32>
    %188 = tpu.matmul %187, %186, %cst_102 {dimension_numbers = #tpu.dot_dimension_numbers<[1], [0], [0], [1], [0, 0, 1, 1], [], []>} : vector<16x16xf32>, vector<16x32xf32>, vector<16x32xf32> -> vector<16x32xf32>
    %189 = arith.addf %183, %188 : vector<16x32xf32>
    %c1_103 = arith.constant 1 : index
    %c3_104 = arith.constant 3 : index
    %c0_105 = arith.constant 0 : index
    %c0_106 = arith.constant 0 : index
    %190 = vector.load %arg4[%c1_103, %c3_104, %c0_105, %c0_106] : memref<2x4x32x32xf32, #tpu.memory_space<vmem>>, vector<1x1x32x32xf32>
    %191 = vector.shape_cast %190 : vector<1x1x32x32xf32> to vector<32x32xf32>
    %cst_107 = arith.constant dense<0.000000e+00> : vector<16x32xf32>
    %192 = tpu.matmul %1, %191, %cst_107 {dimension_numbers = #tpu.dot_dimension_numbers<[1], [0], [0], [1], [0, 0, 1, 1], [], []>} : vector<16x32xf32>, vector<32x32xf32>, vector<16x32xf32> -> vector<16x32xf32>
    %193 = vector.extract_strided_slice %170 {offsets = [48, 0], sizes = [16, 16], strides = [1, 1]} : vector<64x16xf32> to vector<16x16xf32>
    %cst_108 = arith.constant dense<0.000000e+00> : vector<16x32xf32>
    %194 = tpu.matmul %193, %192, %cst_108 {dimension_numbers = #tpu.dot_dimension_numbers<[1], [0], [0], [1], [0, 0, 1, 1], [], []>} : vector<16x16xf32>, vector<16x32xf32>, vector<16x32xf32> -> vector<16x32xf32>
    %195 = arith.addf %189, %194 : vector<16x32xf32>
    %c5 = arith.constant 5 : index
    %c0_109 = arith.constant 0 : index
    %196 = vector.load %arg7[%c5, %c0_109] : memref<8x128xf32, #tpu.memory_space<vmem>>, vector<1x32xf32>
    %197 = vector.broadcast %196 : vector<1x32xf32> to vector<16x32xf32>
    %198 = arith.addf %195, %197 : vector<16x32xf32>
    %199 = arith.addf %102, %198 : vector<16x32xf32>
    %c4_110 = arith.constant 4 : index
    %200 = memref.load %arg0[%c4_110] : memref<6xf32, #tpu.memory_space<smem>>
    %c5_111 = arith.constant 5 : index
    %201 = memref.load %arg0[%c5_111] : memref<6xf32, #tpu.memory_space<smem>>
    %cst_112 = arith.constant dense<0.000000e+00> : vector<16xf32>
    %202 = vector.multi_reduction <add>, %199, %cst_112 [1] : vector<16x32xf32> to vector<16xf32>
    %203 = vector.shape_cast %202 : vector<16xf32> to vector<16x1xf32>
    %cst_113 = arith.constant 3.200000e+01 : f32
    %204 = vector.broadcast %cst_113 : f32 to vector<16x1xf32>
    %205 = arith.divf %203, %204 : vector<16x1xf32>
    %206 = vector.broadcast %205 : vector<16x1xf32> to vector<16x32xf32>
    %207 = arith.subf %199, %206 : vector<16x32xf32>
    %208 = arith.mulf %207, %207 : vector<16x32xf32>
    %cst_114 = arith.constant dense<0.000000e+00> : vector<16xf32>
    %209 = vector.multi_reduction <add>, %208, %cst_114 [1] : vector<16x32xf32> to vector<16xf32>
    %210 = vector.shape_cast %209 : vector<16xf32> to vector<16x1xf32>
    %cst_115 = arith.constant 0.0322580636 : f32
    %211 = vector.broadcast %cst_115 : f32 to vector<16x1xf32>
    %212 = arith.mulf %210, %211 : vector<16x1xf32>
    %213 = vector.broadcast %205 : vector<16x1xf32> to vector<16x32xf32>
    %214 = arith.subf %199, %213 : vector<16x32xf32>
    %215 = vector.broadcast %200 : f32 to vector<16x32xf32>
    %216 = arith.mulf %215, %214 : vector<16x32xf32>
    %217 = math.sqrt %212 : vector<16x1xf32>
    %cst_116 = arith.constant 9.99999997E-7 : f32
    %218 = vector.broadcast %cst_116 : f32 to vector<16x1xf32>
    %219 = arith.addf %217, %218 : vector<16x1xf32>
    %220 = tpu.reciprocal %219 {approx = true} : vector<16x1xf32> -> vector<16x1xf32>
    %221 = arith.mulf %219, %220 : vector<16x1xf32>
    %cst_117 = arith.constant 2.000000e+00 : f32
    %222 = vector.broadcast %cst_117 : f32 to vector<16x1xf32>
    %223 = arith.subf %222, %221 : vector<16x1xf32>
    %224 = arith.mulf %220, %223 : vector<16x1xf32>
    %225 = arith.mulf %219, %224 : vector<16x1xf32>
    %cst_118 = arith.constant 2.000000e+00 : f32
    %226 = vector.broadcast %cst_118 : f32 to vector<16x1xf32>
    %227 = arith.subf %226, %225 : vector<16x1xf32>
    %228 = arith.mulf %224, %227 : vector<16x1xf32>
    %229 = vector.broadcast %228 : vector<16x1xf32> to vector<16x32xf32>
    %230 = arith.mulf %216, %229 : vector<16x32xf32>
    %231 = vector.broadcast %201 : f32 to vector<16x32xf32>
    %232 = arith.addf %230, %231 : vector<16x32xf32>
    %c0_119 = arith.constant 0 : index
    %c0_120 = arith.constant 0 : index
    %233 = vector.load %arg5[%c0_119, %c0_120] : memref<32x64xf32, #tpu.memory_space<vmem>>, vector<32x64xf32>
    %cst_121 = arith.constant dense<0.000000e+00> : vector<16x64xf32>
    %234 = tpu.matmul %232, %233, %cst_121 {dimension_numbers = #tpu.dot_dimension_numbers<[1], [0], [0], [1], [0, 0, 1, 1], [], []>} : vector<16x32xf32>, vector<32x64xf32>, vector<16x64xf32> -> vector<16x64xf32>
    %c6 = arith.constant 6 : index
    %c0_122 = arith.constant 0 : index
    %235 = vector.load %arg7[%c6, %c0_122] : memref<8x128xf32, #tpu.memory_space<vmem>>, vector<1x64xf32>
    %236 = vector.broadcast %235 : vector<1x64xf32> to vector<16x64xf32>
    %237 = arith.addf %234, %236 : vector<16x64xf32>
    %cst_123 = arith.constant 0.000000e+00 : f32
    %238 = vector.broadcast %cst_123 : f32 to vector<16x64xf32>
    %239 = arith.maximumf %237, %238 : vector<16x64xf32>
    %c0_124 = arith.constant 0 : index
    %c0_125 = arith.constant 0 : index
    %240 = vector.load %arg6[%c0_124, %c0_125] : memref<64x32xf32, #tpu.memory_space<vmem>>, vector<64x32xf32>
    %cst_126 = arith.constant dense<0.000000e+00> : vector<16x32xf32>
    %241 = tpu.matmul %239, %240, %cst_126 {dimension_numbers = #tpu.dot_dimension_numbers<[1], [0], [0], [1], [0, 0, 1, 1], [], []>} : vector<16x64xf32>, vector<64x32xf32>, vector<16x32xf32> -> vector<16x32xf32>
    %242 = arith.addf %199, %241 : vector<16x32xf32>
    %c7 = arith.constant 7 : index
    %c0_127 = arith.constant 0 : index
    %243 = vector.load %arg7[%c7, %c0_127] : memref<8x128xf32, #tpu.memory_space<vmem>>, vector<1x32xf32>
    %244 = vector.broadcast %243 : vector<1x32xf32> to vector<16x32xf32>
    %245 = arith.addf %242, %244 : vector<16x32xf32>
    %c0_128 = arith.constant 0 : index
    %c0_129 = arith.constant 0 : index
    %246 = vector.load %arg10[%c0_128, %c0_129] : memref<16x32xf32, #tpu.memory_space<vmem>>, vector<16x32xf32>
    tpu.vector_store %arg10[%c0_128, %c0_129], %245 {strides = array<i32>} : memref<16x32xf32, #tpu.memory_space<vmem>>, vector<16x32xf32>,
    return
  }
}

</mosaic_0001>

<bundles_post_ra>
// kernel: decoder_block.1
= control target key start
LH: loop header
LB: loop body
LE: loop exit
PB: predicated region body
PF: predicated region fallthrough
CT: control target
= control target key end

     0   :  { %15 = vsyncpa [#allocation5], 0  ;;  %s4299_s0 = inlined_call_operand.vmem [shape: f32[6], index: 0, kind: input, shape index: {}]   ;;  %s4300_s1 = inlined_call_operand.vmem [shape: f32[16,32], index: 1, kind: input, shape index: {}]   ;;  %s4301_s2 = inlined_call_operand.hbm [shape: f32[16,32], index: 2, kind: input, shape index: {}]   ;;  %s4302_s3 = inlined_call_operand.hbm [shape: f32[4,32,32], index: 3, kind: input, shape index: {}]   ;;  %s4303_s4 = inlined_call_operand.vmem [shape: f32[2,4,32,32], index: 4, kind: input, shape index: {}]   ;;  %s4304_s5 = inlined_call_operand.vmem [shape: f32[32,64], index: 5, kind: input, shape index: {}]   ;;  %s4305_s6 = inlined_call_operand.vmem [shape: f32[64,32], index: 6, kind: input, shape index: {}]   ;;  %s4306_s7 = inlined_call_operand.vmem [shape: f32[8,128], index: 7, kind: input, shape index: {}]   ;;  %s4307_s8 = inlined_call_operand.vmem [shape: f32[64,32], index: 8, kind: input, shape index: {}]   ;;  %s4308_s9 = inlined_call_operand.vmem [shape: f32[64,16], index: 9, kind: input, shape index: {}]   ;;  %s4309_s10 = inlined_call_operand.hbm [shape: f32[16,32], index: 10, kind: output, shape index: {}]  }
   0x1   :  { %16 = vsyncpa [#allocation3], 0 }
   0x2   :  { %17 = vsyncpa [#allocation8], 0 }
   0x3   :  { %18 = vsyncpa [#allocation4], 0  ;;  %s25_s15 = sshll.u32 %s4299_s0, 4  ;;  %s26_s15 = int_to_ptr.vmem [resolvable:$true] %s25_s15 }
   0x4   :  { %s3509_s16 = scalar_lea.vmem %s26_s15, 16  ;;  %p3514_p1 = scmp.lt.s32.totalorder %s26_s15, %s26_s15 }
   0x5   :  { %p3510_p0 = scmp.ne.s32.totalorder %s26_s15, %s3509_s16  ;;  %p3515_p2 = scmp.lt.s32.totalorder %s3509_s16, %s3509_s16 }
   0x7   :  { %p3516_p3 = por %p3515_p2, %p3514_p1 }
   0x9   :  { %p3517_p4 = pnand %p3516_p3, %p3510_p0 }
   0xb   :  { %3520 = shalt.err (!%p3517_p4)
}
   0xc   :  { %s3595_s17 = smov [#allocation2]   ;;  %s3596_s18 = smov [#allocation6]  }
   0xd   :  { %28 = dma.vmem_to_smem %s26_s15, 16, %s3595_s17, [#allocation5]  }
   0xe   :  { %s36_s19 = sshll.u32 %s3596_s18, 4  ;;  %s3521_s22 = scalar_lea.hbm %s4301_s2, 256  ;;  %s37_s19 = int_to_ptr.vmem [resolvable:$true] %s36_s19 }
   0xf   :  { %p3522_p5 = scmp.ne.s32.totalorder %s4301_s2, %s3521_s22  ;;  %p3525_p6 = scmp.lt.u32.totalorder %s3521_s22, %s4301_s2 }
  0x11   :  { %p3527_p7 = pnand %p3525_p6, %p3522_p5 }
  0x13   :  { %3530 = shalt.err (!%p3527_p7)
}
  0x14   :  { %s3531_s26 = scalar_lea.vmem %s37_s19, 256  ;;  %p3536_p9 = scmp.lt.s32.totalorder %s37_s19, %s37_s19 }
  0x15   :  { %p3532_p8 = scmp.ne.s32.totalorder %s37_s19, %s3531_s26  ;;  %p3537_p10 = scmp.lt.s32.totalorder %s3531_s26, %s3531_s26 }
  0x17   :  { %p3538_p11 = por %p3537_p10, %p3536_p9 }
  0x19   :  { %p3539_p12 = pnand %p3538_p11, %p3532_p8 }
  0x1b   :  { %3542 = shalt.err (!%p3539_p12)
}
  0x1c   :  { %s3597_s27 = smov 128   ;;  %s3598_s28 = smov 8  }
  0x1d   :  { %42 = dma.hbm_to_vmem [thread:$0]  %s4301_s2, 256, %s37_s19, [#allocation3], %s3597_s27, %s3597_s27, %s3598_s28  }
  0x1e   :  { %s3599_s11 = smov [#allocation7]   ;;  %s3543_s15 = scalar_lea.hbm %s4302_s3, 2048 }
  0x1f   :  { %s48_s12 = sshll.u32 %s3599_s11, 4  ;;  %p3544_p13 = scmp.ne.s32.totalorder %s4302_s3, %s3543_s15  ;;  %s49_s12 = int_to_ptr.vmem [resolvable:$true] %s48_s12 }
  0x20   :  { %p3547_p0 = scmp.lt.u32.totalorder %s3543_s15, %s4302_s3 }
  0x22   :  { %p3549_p1 = pnand %p3547_p0, %p3544_p13 }
  0x24   :  { %3552 = shalt.err (!%p3549_p1)
}
  0x25   :  { %s3553_s21 = scalar_lea.vmem %s49_s12, 2048  ;;  %p3558_p3 = scmp.lt.s32.totalorder %s49_s12, %s49_s12 }
  0x26   :  { %p3554_p2 = scmp.ne.s32.totalorder %s49_s12, %s3553_s21  ;;  %p3559_p4 = scmp.lt.s32.totalorder %s3553_s21, %s3553_s21 }
  0x28   :  { %p3560_p5 = por %p3559_p4, %p3558_p3 }
  0x2a   :  { %p3561_p6 = pnand %p3560_p5, %p3554_p2 }
  0x2c   :  { %3564 = shalt.err (!%p3561_p6)
}
  0x2d   :  { %54 = dma.hbm_to_vmem [thread:$0]  %s4302_s3, 2048, %s49_s12, [#allocation8], %s3597_s27, %s3597_s27, %s3598_s28  }
  0x2e   :  { %3587 = dma.done.wait [#allocation5], 16  }
  0x2f   :  { %3588 = vsyncadd [#allocation5], 4294967280 }
  0x30   :  { %3589 = dma.done.wait [#allocation3], 256  }
  0x31   :  { %3590 = vsyncadd [#allocation3], 4294967040 }
  0x32   :  { %3591 = dma.done.wait [#allocation8], 2048  }
  0x33   :  { %3592 = vsyncadd [#allocation8], 4294965248 }
  0x34   :  { %76 = sfence }
  0x35   :  { %v3692_v0 = vld [vmem:[%s4300_s1] sm:$0xff]  ;;  %vm107_vm0 = vcmask 261120   ;;  %v3697_v1 = vld [vmem:[%s4300_s1 + $0x8] sm:$0xff]  ;;  %v258_v14 = vld [vmem:[#allocation7 + $0x20] sm:$0xff]  ;;  %s105_s29 = sld [smem:[#allocation2]]  ;;  %s2744_s30 = sld [smem:[#allocation2 + $0x1]] }
  0x36   :  { %v108_v2 = vsel %vm107_vm0, %v3692_v0, 0.0  ;;  %v111_v3 = vsel %vm107_vm0, %v3697_v1, 0.0  ;;  %v259_v15 = vld [vmem:[#allocation7 + $0x28] sm:$0xff]  ;;  %v167_v16 = vld [vmem:[#allocation7] sm:$0xff]  ;;  %v260_v19 = vld [vmem:[#allocation7 + $0x30] sm:$0xff]  ;;  %vm493_vm8 = vcmask 130048  }
  0x37   :  { %109 = vadd.xlane.f32.xlu0 %v108_v2  ;;  %v3247_v17 = vpack.c.bf16 %v259_v15, %v258_v14  ;;  %v168_v18 = vld [vmem:[#allocation7 + $0x8] sm:$0xff]  ;;  %v261_v20 = vld [vmem:[#allocation7 + $0x38] sm:$0xff]  ;;  %v169_v23 = vld [vmem:[#allocation7 + $0x10] sm:$0xff]  ;;  %s2790_s26 = sld [smem:[#allocation2 + $0x2]]  ;;  %s2841_s18 = sld [smem:[#allocation2 + $0x4]] }
  0x38   :  { %v3239_v21 = vpack.c.bf16 %v168_v18, %v167_v16  ;;  %v3251_v22 = vpack.c.bf16 %v261_v20, %v260_v19  ;;  %v170_v24 = vld [vmem:[#allocation7 + $0x18] sm:$0xff]  ;;  %v630_v26 = vld [vmem:[%s4303_s4] sm:$0xff]  ;;  %vm3780_vm5 = vmpackc.low %vm107_vm0, %vm107_vm0  ;;  %s2842_s20 = sld [smem:[#allocation2 + $0x5]] }
  0x39   :  { %3248 = vmatprep.subr.bf16.mxu1 %v3247_v17  ;;  %v3243_v25 = vpack.c.bf16 %v170_v24, %v169_v23  ;;  %v631_v27 = vld [vmem:[%s4303_s4 + $0x8] sm:$0xff]  ;;  %v2748_v14 = vld [vmem:[%s4306_s7 + $0x1] ss:$0 sm:$0xff]  ;;  %v2745_v15 = vld [vmem:[%s4306_s7] ss:$0 sm:$0xff] }
  0x3a   :  { %3240 = vmatprep.subr.bf16.mxu0 %v3239_v21  ;;  %3250 = vmatpush3.bf16.msra.mxu1 %v3247_v17  ;;  %v3261_v28 = vpack.c.bf16 %v631_v27, %v630_v26  ;;  %v2774_v23 = vld [vmem:[%s4303_s4 + $0x48] sm:$0xff] }
  0x3b   :  { %112 = vadd.xlane.f32.xlu0 %v111_v3  ;;  %3242 = vmatpush3.bf16.msra.mxu0 %v3239_v21  ;;  %v129_v53 = vstv %s105_s29  ;;  %v164_v59 = vstv %s2744_s30  ;;  %v632_v3 = vld [vmem:[%s4303_s4 + $0x10] sm:$0xff]  ;;  %v3770_v21 = vld [vmem:[%s4307_s8] sm:$0xff]  ;;  %s2791_s29 = sld [smem:[#allocation2 + $0x3]] }
  0x3c   :  { %3252 = vmatprep.subr.bf16.mxu1 %v3251_v22  ;;  %3244 = vmatprep.subr.bf16.mxu0 %v3243_v25 }
  0x3e   :  { %3254 = vmatpush3.bf16.msra.mxu1 %v3251_v22  ;;  %v2773_v22 = vld [vmem:[%s4303_s4 + $0x40] sm:$0xff] }
  0x3f   :  { %3246 = vmatpush3.bf16.msra.mxu0 %v3243_v25  ;;  %3262 = vmatprep.subr.bf16.mxu1 %v3261_v28 }
  0xc4   :  { %v110_v4 = vpop.xlane.xlu0 %109 }
  0xc5   :  { %v115_v5 = vmul.f32 0.03125, %v110_v4  ;;  %v633_v4 = vld [vmem:[%s4303_s4 + $0x18] sm:$0xff] }
  0xc7   :  { %v3704_v6 = vsub.f32 %v3692_v0, %v115_v5 }
  0xc8   :  { %v113_v7 = vpop.xlane.xlu0 %112 }
  0xc9   :  { %v116_v8 = vmul.f32 0.03125, %v113_v7  ;;  %v119_v9 = vmul.f32 %v3704_v6, %v3704_v6  ;;  %v130_v56 = vmul.f32 %v129_v53, %v3704_v6  ;;  %v3265_v7 = vpack.c.bf16 %v633_v4, %v632_v3 }
  0xcb   :  { %v3709_v10 = vsub.f32 %v3697_v1, %v116_v8  ;;  %v121_v11 = vsel %vm107_vm0, %v119_v9, 0.0  ;;  %v2763_v8 = vld [vmem:[%s4303_s4 + $0x20] sm:$0xff]  ;;  %v2764_v9 = vld [vmem:[%s4303_s4 + $0x28] sm:$0xff] }
  0xcc   :  { %122 = vadd.xlane.f32.xlu1 %v121_v11  ;;  %v2765_v11 = vld [vmem:[%s4303_s4 + $0x30] sm:$0xff] }
  0xcd   :  { %v120_v12 = vmul.f32 %v3709_v10, %v3709_v10  ;;  %v131_v62 = vmul.f32 %v129_v53, %v3709_v10  ;;  %v3269_v10 = vpack.c.bf16 %v2764_v9, %v2763_v8 }
  0xcf   :  { %v124_v13 = vsel %vm107_vm0, %v120_v12, 0.0  ;;  %v2766_v12 = vld [vmem:[%s4303_s4 + $0x38] sm:$0xff] }
  0xd0   :  { %125 = vadd.xlane.f32.xlu1 %v124_v13  ;;  %v3273_v13 = vpack.c.bf16 %v2766_v12, %v2765_v11 }
 0x159   :  { %v123_v29 = vpop.xlane.xlu1 %122 }
 0x15a   :  { %v127_v30 = vmul.f32 0.032258064, %v123_v29  ;;  %v3285_v29 = vpack.c.bf16 %v2774_v23, %v2773_v22  ;;  %v3894_v23 = vld [vmem:[%s4308_s9] sm:$0xff] }
 0x15b   :  { %vm97_vm12 = vcmp.gt.f32.partialorder %v3894_v23, 0.5 }
 0x15c   :  { %3421 = vrsqrt.f32 %v127_v30  ;;  %vm134_vm1 = vcmp.eq.f32.partialorder %v127_v30, inf  ;;  %v137_v35 = vand.u32 2147483648, %v127_v30  ;;  %vm136_vm2 = vcmp.eq.f32.partialorder %v127_v30, 0.0 }
 0x15d   :  { %v126_v31 = vpop.xlane.xlu1 %125 }
 0x15e   :  { %v128_v32 = vmul.f32 0.032258064, %v126_v31 }
 0x160   :  { %3423 = vrsqrt.f32 %v128_v32  ;;  %vm141_vm3 = vcmp.eq.f32.partialorder %v128_v32, inf  ;;  %v144_v41 = vand.u32 2147483648, %v128_v32  ;;  %vm143_vm4 = vcmp.eq.f32.partialorder %v128_v32, 0.0 }
 0x166   :  { %v3422_v33 = vpop.eup %3421 }
 0x167   :  { %v133_v34 = vmul.f32 %v3422_v33, %v127_v30 }
 0x169   :  { %v135_v36 = vsel %vm134_vm1, %v127_v30, %v133_v34  ;;  %v2775_v34 = vld [vmem:[%s4303_s4 + $0x50] sm:$0xff] }
 0x16a   :  { %v3424_v37 = vpop.eup %3423  ;;  %v138_v38 = vsel %vm136_vm2, %v137_v35, %v135_v36  ;;  %v2776_v35 = vld [vmem:[%s4303_s4 + $0x58] sm:$0xff] }
 0x16b   :  { %v146_v39 = vadd.f32 1e-06, %v138_v38  ;;  %v140_v40 = vmul.f32 %v3424_v37, %v128_v32  ;;  %v3806_v37 = vld [vmem:[%s4307_s8 + $0x10] sm:$0xff] }
 0x16d   :  { %3425 = vrcp.f32 %v146_v39  ;;  %v142_v42 = vsel %vm141_vm3, %v128_v32, %v140_v40  ;;  %v3793_v32 = vld [vmem:[%s4307_s8 + $0x8] sm:$0xff] }
 0x16e   :  { %v145_v43 = vsel %vm143_vm4, %v144_v41, %v142_v42  ;;  %v3813_v41 = vld [vmem:[%s4307_s8 + $0x18] sm:$0xff]  ;;  %v3819_v42 = vld [vmem:[%s4307_s8 + $0x20] sm:$0xff] }
 0x16f   :  { %v147_v44 = vadd.f32 1e-06, %v145_v43 }
 0x171   :  { %3427 = vrcp.f32 %v147_v44 }
 0x177   :  { %v3426_v45 = vpop.eup %3425 }
 0x178   :  { %v150_v46 = vmul.f32 %v3426_v45, %v146_v39 }
 0x17a   :  { %v152_v47 = vsub.f32 2.0, %v150_v46 }
 0x17b   :  { %v3428_v48 = vpop.eup %3427 }
 0x17c   :  { %v151_v49 = vmul.f32 %v3428_v48, %v147_v44  ;;  %v154_v50 = vmul.f32 %v3426_v45, %v152_v47  ;;  %v3827_v47 = vld [vmem:[%s4307_s8 + $0x28] sm:$0xff] }
 0x17e   :  { %v156_v51 = vmul.f32 %v154_v50, %v146_v39  ;;  %v153_v52 = vsub.f32 2.0, %v151_v49  ;;  %v3289_v39 = vpack.c.bf16 %v2776_v35, %v2775_v34  ;;  %v3833_v49 = vld [vmem:[%s4307_s8 + $0x30] sm:$0xff] }
 0x180   :  { %v158_v54 = vsub.f32 2.0, %v156_v51  ;;  %v155_v55 = vmul.f32 %v3428_v48, %v153_v52  ;;  %v3841_v52 = vld [vmem:[%s4307_s8 + $0x38] sm:$0xff] }
 0x182   :  { %v160_v57 = vmul.f32 %v158_v54, %v154_v50  ;;  %v157_v58 = vmul.f32 %v155_v55, %v147_v44 }
 0x184   :  { %v162_v60 = vmul.f32 %v160_v57, %v130_v56  ;;  %v159_v61 = vsub.f32 2.0, %v157_v58  ;;  %v3855_v56 = vld [vmem:[%s4308_s9 + $0x28] sm:$0xff]  ;;  %v3860_v58 = vld [vmem:[%s4308_s9 + $0x20] sm:$0xff] }
 0x185   :  { %vm102_vm6 = vcmp.gt.f32.partialorder %v3855_v56, 0.5  ;;  %vm101_vm7 = vcmp.gt.f32.partialorder %v3860_v58, 0.5 }
 0x186   :  { %v3723_v63 = vadd.f32 %v164_v59, %v162_v60  ;;  %v161_v2 = vmul.f32 %v159_v61, %v155_v55 }
 0x188   :  { %2997 = vmatprep.mubr.msk.f32.mxu0 %vm107_vm0, %v3723_v63  ;;  %3008 = vmatprep.mubr.msk.f32.mxu1 %vm107_vm0, %v3723_v63  ;;  %v163_v5 = vmul.f32 %v161_v2, %v131_v62 }
 0x18a   :  { %v3735_v6 = vadd.f32 %v164_v59, %v163_v5 }
 0x18c   :  { %2998 = vmatmul.mubr.msk.f32.vlgmr.msra.gmra.mrb[0].mxu0 %vm107_vm0, %v3735_v6  ;;  %3009 = vmatmul.mubr.msk.f32.vlgmr.msra.gmra.mrb[0].mxu1 %vm107_vm0, %v3735_v6 }
 0x18d   :  { %3264 = vmatpush3.bf16.msra.mxu1 %v3261_v28  ;;  %3035 = vmatprep.mubr.msk.f32.mxu1 %vm107_vm0, %v3723_v63 }
 0x18e   :  { %3266 = vmatprep.subr.bf16.mxu1 %v3265_v7 }
 0x191   :  { %3268 = vmatpush3.bf16.msra.mxu1 %v3265_v7 }
 0x192   :  { %3270 = vmatprep.subr.bf16.mxu1 %v3269_v10 }
 0x194   :  { %3036 = vmatmul.mubr.msk.f32.vlgmr.msra.gmra.mrb[2].mxu1 %vm107_vm0, %v3735_v6 }
 0x195   :  { %3272 = vmatpush3.bf16.msra.mxu1 %v3269_v10  ;;  %3046 = vmatprep.mubr.msk.f32.mxu1 %vm107_vm0, %v3723_v63 }
 0x196   :  { %3274 = vmatprep.subr.bf16.mxu1 %v3273_v13 }
 0x199   :  { %3276 = vmatpush3.bf16.msra.mxu1 %v3273_v13 }
 0x19c   :  { %3047 = vmatmul.mubr.msk.f32.vlgmr.msra.gmra.mrb[4].mxu1 %vm107_vm0, %v3735_v6 }
 0x25f   :  { %v2999_v16 = vpop.f32.mrb[0].mxu0  ;;  %v3010_v17 = vpop.f32.mrb[0].mxu1 }
 0x260   :  { %v339_v18 = vadd.f32 %v3010_v17, %v2748_v14  ;;  %v248_v19 = vpop.f32.mrb[1].mxu0  ;;  %v333_v20 = vpop.f32.mrb[1].mxu1  ;;  %v254_v30 = vadd.f32 %v2999_v16, %v2745_v15  ;;  %v3873_v17 = vld [vmem:[%s4308_s9 + $0x18] sm:$0xff] }
 0x261   :  { %v249_v24 = vadd.f32 %v2745_v15, %v248_v19  ;;  %v334_v25 = vadd.f32 %v2748_v14, %v333_v20  ;;  %vm100_vm9 = vcmp.gt.f32.partialorder %v3873_v17, 0.5  ;;  %v3886_v20 = vld [vmem:[%s4308_s9 + $0x8] sm:$0xff] }
 0x262   :  { %v343_v38 = vmul.f32 %v254_v30, %v3793_v32  ;;  %v345_v44 = vmul.f32 %v254_v30, %v3813_v41  ;;  %v347_v50 = vmul.f32 %v254_v30, %v3827_v47  ;;  %v349_v53 = vmul.f32 %v254_v30, %v3841_v52  ;;  %v3914_v30 = vld [vmem:[%s4308_s9 + $0x30] sm:$0xff] }
 0x263   :  { %v3255_v27 = vpack.c.bf16 %v339_v18, %v334_v25  ;;  %v342_v28 = vmul.f32 %v249_v24, %v3770_v21  ;;  %v344_v40 = vmul.f32 %v249_v24, %v3806_v37  ;;  %v346_v46 = vmul.f32 %v249_v24, %v3819_v42  ;;  %v3878_v18 = vld [vmem:[%s4308_s9 + $0x10] sm:$0xff] }
 0x264   :  { %v348_v51 = vmul.f32 %v249_v24, %v3833_v49  ;;  %vm99_vm10 = vcmp.gt.f32.partialorder %v3878_v18, 0.5  ;;  %vm98_vm11 = vcmp.gt.f32.partialorder %v3886_v20, 0.5  ;;  %vm103_vm14 = vcmp.gt.f32.partialorder %v3914_v30, 0.5 }
 0x265   :  { %3257 = vmatprep.subr.msk.bf16.mxu0 %vm3780_vm5, %v3255_v27  ;;  %3015 = vmatprep.mubr.msk.f32.mxu0 %vm107_vm0, %v342_v28 }
 0x266   :  { %3260 = vmatpush3.bf16.xpose.msk.msra.mxu0 %vm3780_vm5, %v3255_v27 }
 0x267   :  { %v3037_v31 = vpop.f32.mrb[2].mxu1  ;;  %3286 = vmatprep.subr.bf16.mxu0 %v3285_v29 }
 0x268   :  { %v700_v33 = vpop.f32.mrb[3].mxu1 }
 0x269   :  { %v3801_v36 = vpack.c.bf16 %v3037_v31, %v700_v33 }
 0x26d   :  { %3016 = vmatmul.mubr.msk.f32.vlgmr.msra.gmra.mrb[2].mxu0 %vm107_vm0, %v343_v38 }
 0x26e   :  { %3018 = vmatprep.mubr.msk.f32.mxu0 %vm107_vm0, %v344_v40  ;;  %3288 = vmatpush3.bf16.msra.mxu0 %v3285_v29  ;;  %v3909_v29 = vld [vmem:[%s4308_s9 + $0x38] sm:$0xff] }
 0x26f   :  { %v3048_v43 = vpop.f32.mrb[4].mxu1  ;;  %3290 = vmatprep.subr.bf16.mxu0 %v3289_v39  ;;  %vm104_vm13 = vcmp.gt.f32.partialorder %v3909_v29, 0.5 }
 0x270   :  { %v780_v45 = vpop.f32.mrb[5].mxu1 }
 0x271   :  { %v3277_v48 = vpack.c.bf16 %v3048_v43, %v780_v45  ;;  %3019 = vmatmul.mubr.msk.f32.gmra.mrb[4].mxu0 %vm107_vm0, %v345_v44 }
 0x272   :  { %3021 = vmatprep.mubr.msk.f32.mxu0 %vm107_vm0, %v346_v46  ;;  %3292 = vmatpush3.bf16.msra.mxu0 %v3289_v39  ;;  %v2781_v46 = vld [vmem:[%s4303_s4 + $0x60] sm:$0xff] }
 0x273   :  { %3278 = vmatprep.subr.bf16.mxu1 %v3277_v48 }
 0x274   :  { %3280 = vmatpush3.bf16.msra.mxu1 %v3277_v48  ;;  %v2782_v48 = vld [vmem:[%s4303_s4 + $0x68] sm:$0xff] }
 0x275   :  { %3282 = vmatprep.subr.bf16.mxu1 %v3801_v36  ;;  %3022 = vmatmul.mubr.msk.f32.gmra.mrb[6].mxu0 %vm107_vm0, %v347_v50  ;;  %v3938_v50 = vpack.c.bf16 %v2782_v48, %v2781_v46 }
 0x276   :  { %3024 = vmatprep.mubr.msk.f32.mxu0 %vm107_vm0, %v348_v51 }
 0x279   :  { %3025 = vmatmul.mubr.msk.f32.gmra.mrb[8].mxu0 %vm107_vm0, %v349_v53 }
 0x27a   :  { %3071 = vmatprep.mubr.msk.f32.mxu0 %vm107_vm0, %v3723_v63 }
 0x27d   :  { %3072 = vmatmul.mubr.msk.f32.vlgmr.msra.gmra.mrb[10].mxu0 %vm107_vm0, %v3735_v6 }
 0x340   :  { %v3017_v54 = vpop.f32.mrb[2].mxu0 }
 0x341   :  { %v446_v55 = vpop.f32.mrb[3].mxu0  ;;  %v486_v33 = vsel %vm98_vm11, %v3017_v54, -1e+30 }
 0x342   :  { %v485_v35 = vsel %vm97_vm12, %v446_v55, -1e+30  ;;  %v497_v38 = vsel %vm493_vm8, %v486_v33, -inf }
 0x343   :  { %v494_v40 = vsel %vm493_vm8, %v485_v35, -inf }
 0x344   :  { %v3020_v57 = vpop.f32.mrb[4].mxu0 }
 0x345   :  { %v456_v59 = vpop.f32.mrb[5].mxu0  ;;  %v488_v25 = vsel %vm100_vm9, %v3020_v57, -1e+30 }
 0x346   :  { %v487_v28 = vsel %vm99_vm10, %v456_v59, -1e+30  ;;  %v503_v31 = vsel %vm493_vm8, %v488_v25, -inf }
 0x347   :  { %v500_v34 = vsel %vm493_vm8, %v487_v28, -inf }
 0x348   :  { %v3023_v60 = vpop.f32.mrb[6].mxu0 }
 0x349   :  { %v490_v61 = vsel %vm102_vm6, %v3023_v60, -1e+30  ;;  %v466_v62 = vpop.f32.mrb[7].mxu0 }
 0x34a   :  { %v489_v2 = vsel %vm101_vm7, %v466_v62, -1e+30  ;;  %v509_v3 = vsel %vm493_vm8, %v490_v61, -inf }
 0x34b   :  { %510 = vmax.xlane.f32.xlu1 %v509_v3  ;;  %v506_v4 = vsel %vm493_vm8, %v489_v2, -inf }
 0x34c   :  { %507 = vmax.xlane.f32.xlu0 %v506_v4  ;;  %v3026_v5 = vpop.f32.mrb[8].mxu0 }
 0x34d   :  { %v476_v7 = vpop.f32.mrb[9].mxu0  ;;  %v492_v39 = vsel %vm104_vm13, %v3026_v5, -1e+30 }
 0x34e   :  { %v491_v43 = vsel %vm103_vm14, %v476_v7, -1e+30  ;;  %v515_v44 = vsel %vm493_vm8, %v492_v39, -inf }
 0x34f   :  { %v512_v45 = vsel %vm493_vm8, %v491_v43, -inf }
 0x350   :  { %v3073_v8 = vpop.f32.mrb[10].mxu0 }
 0x351   :  { %v1022_v9 = vpop.f32.mrb[11].mxu0 }
 0x352   :  { %v3293_v10 = vpack.c.bf16 %v3073_v8, %v1022_v9 }
 0x354   :  { %3294 = vmatprep.subr.bf16.mxu0 %v3293_v10 }
 0x355   :  { %3296 = vmatpush3.bf16.msra.mxu0 %v3293_v10 }
 0x356   :  { %3298 = vmatprep.subr.bf16.mxu0 %v3938_v50 }
 0x3d8   :  { %v511_v11 = vpop.xlane.xlu1 %510 }
 0x3d9   :  { %v523_v12 = vsub.f32 %v490_v61, %v511_v11  ;;  %v508_v13 = vpop.xlane.xlu0 %507 }
 0x3da   :  { %v522_v14 = vsub.f32 %v489_v2, %v508_v13 }
 0x3db   :  { %v536_v15 = vmul.f32 1.442695, %v523_v12 }
 0x3dc   :  { %v534_v16 = vmul.f32 1.442695, %v522_v14 }
 0x3dd   :  { %3429 = vpow2.f32 %v536_v15 }
 0x3de   :  { %3431 = vpow2.f32 %v534_v16 }
 0x3e7   :  { %v3881_v19 = vpop.eup %3429 }
 0x3e8   :  { %v3889_v22 = vpop.eup %3431  ;;  %v557_v24 = vsel %vm493_vm8, %v3881_v19, 0.0 }
 0x3e9   :  { %558 = vadd.xlane.f32.xlu1 %v557_v24  ;;  %v554_v27 = vsel %vm493_vm8, %v3889_v22, 0.0 }
 0x3ea   :  { %555 = vadd.xlane.f32.xlu0 %v554_v27 }
 0x3ed   :  { %504 = vmax.xlane.f32.xlu1 %v503_v31 }
 0x3ee   :  { %501 = vmax.xlane.f32.xlu0 %v500_v34 }
 0x3f1   :  { %498 = vmax.xlane.f32.xlu1 %v497_v38 }
 0x3f2   :  { %495 = vmax.xlane.f32.xlu0 %v494_v40 }
 0x3f5   :  { %516 = vmax.xlane.f32.xlu1 %v515_v44 }
 0x3f6   :  { %513 = vmax.xlane.f32.xlu0 %v512_v45 }
 0x476   :  { %v559_v51 = vpop.xlane.xlu1 %558 }
 0x477   :  { %3433 = vrcp.f32 %v559_v51  ;;  %v556_v53 = vpop.xlane.xlu0 %555 }
 0x478   :  { %3435 = vrcp.f32 %v556_v53 }
 0x47a   :  { %v505_v54 = vpop.xlane.xlu1 %504 }
 0x47b   :  { %v521_v55 = vsub.f32 %v488_v25, %v505_v54  ;;  %v502_v57 = vpop.xlane.xlu0 %501  ;;  %v2783_v54 = vld [vmem:[%s4303_s4 + $0x70] sm:$0xff] }
 0x47c   :  { %v520_v59 = vsub.f32 %v487_v28, %v502_v57 }
 0x47d   :  { %v532_v60 = vmul.f32 1.442695, %v521_v55  ;;  %v2784_v55 = vld [vmem:[%s4303_s4 + $0x78] sm:$0xff] }
 0x47e   :  { %v530_v61 = vmul.f32 1.442695, %v520_v59  ;;  %v499_v62 = vpop.xlane.xlu1 %498 }
 0x47f   :  { %3437 = vpow2.f32 %v532_v60  ;;  %v519_v2 = vsub.f32 %v486_v33, %v499_v62  ;;  %v496_v3 = vpop.xlane.xlu0 %495  ;;  %v3301_v62 = vpack.c.bf16 %v2784_v55, %v2783_v54 }
 0x480   :  { %3439 = vpow2.f32 %v530_v61  ;;  %v518_v4 = vsub.f32 %v485_v35, %v496_v3 }
 0x481   :  { %v3434_v5 = vpop.eup %3433  ;;  %v528_v7 = vmul.f32 1.442695, %v519_v2 }
 0x482   :  { %v3436_v8 = vpop.eup %3435  ;;  %v579_v9 = vmul.f32 %v3434_v5, %v559_v51  ;;  %v526_v10 = vmul.f32 1.442695, %v518_v4  ;;  %v517_v11 = vpop.xlane.xlu1 %516 }
 0x483   :  { %v578_v12 = vmul.f32 %v3436_v8, %v556_v53  ;;  %3441 = vpow2.f32 %v528_v7  ;;  %v525_v13 = vsub.f32 %v492_v39, %v517_v11  ;;  %v514_v14 = vpop.xlane.xlu0 %513 }
 0x484   :  { %v587_v15 = vsub.f32 2.0, %v579_v9  ;;  %3443 = vpow2.f32 %v526_v10  ;;  %v524_v16 = vsub.f32 %v491_v43, %v514_v14 }
 0x485   :  { %v586_v24 = vsub.f32 2.0, %v578_v12  ;;  %v540_v25 = vmul.f32 1.442695, %v525_v13 }
 0x486   :  { %v595_v27 = vmul.f32 %v3434_v5, %v587_v15  ;;  %v538_v28 = vmul.f32 1.442695, %v524_v16 }
 0x487   :  { %v594_v31 = vmul.f32 %v3436_v8, %v586_v24  ;;  %3445 = vpow2.f32 %v540_v25 }
 0x488   :  { %v603_v33 = vmul.f32 %v595_v27, %v559_v51  ;;  %3447 = vpow2.f32 %v538_v28 }
 0x489   :  { %v3941_v34 = vpop.eup %3437  ;;  %v602_v35 = vmul.f32 %v594_v31, %v556_v53 }
 0x48a   :  { %v3943_v38 = vpop.eup %3439  ;;  %v611_v40 = vsub.f32 2.0, %v603_v33  ;;  %v551_v39 = vsel %vm493_vm8, %v3941_v34, 0.0 }
 0x48b   :  { %v610_v44 = vsub.f32 2.0, %v602_v35  ;;  %552 = vadd.xlane.f32.xlu1 %v551_v39  ;;  %v548_v43 = vsel %vm493_vm8, %v3943_v38, 0.0 }
 0x48c   :  { %v619_v45 = vmul.f32 %v611_v40, %v595_v27  ;;  %549 = vadd.xlane.f32.xlu0 %v548_v43 }
 0x48d   :  { %v3949_v46 = vpop.eup %3441  ;;  %v618_v48 = vmul.f32 %v610_v44, %v594_v31 }
 0x48e   :  { %v3951_v51 = vpop.eup %3443  ;;  %v545_v53 = vsel %vm493_vm8, %v3949_v46, 0.0  ;;  %v627_v60 = vmul.f32 %v3881_v19, %v619_v45 }
 0x48f   :  { %546 = vadd.xlane.f32.xlu1 %v545_v53  ;;  %v542_v57 = vsel %vm493_vm8, %v3951_v51, 0.0  ;;  %v626_v59 = vmul.f32 %v3889_v22, %v618_v48 }
 0x490   :  { %543 = vadd.xlane.f32.xlu0 %v542_v57 }
 0x491   :  { %v3965_v61 = vpop.eup %3445  ;;  %3078 = vmatprep.mubr.msk.f32.mxu0 %vm493_vm8, %v626_v59 }
 0x492   :  { %v3968_v2 = vpop.eup %3447  ;;  %3079 = vmatmul.mubr.msk.f32.vlgmr.msra.gmra.mrb[12].mxu0 %vm493_vm8, %v627_v60  ;;  %v563_v3 = vsel %vm493_vm8, %v3965_v61, 0.0 }
 0x493   :  { %3300 = vmatpush3.bf16.msra.mxu0 %v3938_v50  ;;  %564 = vadd.xlane.f32.xlu1 %v563_v3  ;;  %v560_v22 = vsel %vm493_vm8, %v3968_v2, 0.0 }
 0x494   :  { %3089 = vmatprep.mubr.msk.f32.mxu0 %vm107_vm0, %v3723_v63  ;;  %561 = vadd.xlane.f32.xlu0 %v560_v22 }
 0x495   :  { %3302 = vmatprep.subr.bf16.mxu0 %v3301_v62 }
 0x497   :  { %3304 = vmatpush3.bf16.msra.mxu0 %v3301_v62 }
 0x49a   :  { %3090 = vmatmul.mubr.msk.f32.vlgmr.msra.gmra.mrb[14].mxu0 %vm107_vm0, %v3735_v6 }
 0x518   :  { %v553_v19 = vpop.xlane.xlu1 %552 }
 0x519   :  { %3449 = vrcp.f32 %v553_v19  ;;  %v550_v4 = vpop.xlane.xlu0 %549 }
 0x51a   :  { %3451 = vrcp.f32 %v550_v4 }
 0x51c   :  { %v547_v5 = vpop.xlane.xlu1 %546 }
 0x51d   :  { %3453 = vrcp.f32 %v547_v5  ;;  %v544_v50 = vpop.xlane.xlu0 %543 }
 0x51e   :  { %3455 = vrcp.f32 %v544_v50 }
 0x521   :  { %v562_v7 = vpop.xlane.xlu0 %561 }
 0x522   :  { %3457 = vrcp.f32 %v562_v7 }
 0x523   :  { %v3450_v8 = vpop.eup %3449 }
 0x524   :  { %v3452_v9 = vpop.eup %3451  ;;  %v577_v10 = vmul.f32 %v3450_v8, %v553_v19 }
 0x525   :  { %v576_v63 = vmul.f32 %v3452_v9, %v550_v4 }
 0x526   :  { %v585_v11 = vsub.f32 2.0, %v577_v10 }
 0x527   :  { %v3454_v12 = vpop.eup %3453  ;;  %v584_v13 = vsub.f32 2.0, %v576_v63 }
 0x528   :  { %v3456_v14 = vpop.eup %3455  ;;  %v593_v15 = vmul.f32 %v3450_v8, %v585_v11  ;;  %v575_v6 = vmul.f32 %v3454_v12, %v547_v5 }
 0x529   :  { %v592_v16 = vmul.f32 %v3452_v9, %v584_v13  ;;  %v574_v24 = vmul.f32 %v3456_v14, %v544_v50 }
 0x52a   :  { %v601_v25 = vmul.f32 %v593_v15, %v553_v19  ;;  %v583_v27 = vsub.f32 2.0, %v575_v6 }
 0x52b   :  { %v600_v28 = vmul.f32 %v592_v16, %v550_v4  ;;  %v582_v31 = vsub.f32 2.0, %v574_v24 }
 0x52c   :  { %v3458_v33 = vpop.eup %3457  ;;  %v609_v35 = vsub.f32 2.0, %v601_v25  ;;  %v591_v40 = vmul.f32 %v3454_v12, %v583_v27 }
 0x52d   :  { %v608_v39 = vsub.f32 2.0, %v600_v28  ;;  %v590_v44 = vmul.f32 %v3456_v14, %v582_v31  ;;  %v580_v43 = vmul.f32 %v3458_v33, %v562_v7  ;;  %v2789_v31 = vld [vmem:[%s4306_s7 + $0x4] ss:$0 sm:$0xff] }
 0x52e   :  { %v617_v45 = vmul.f32 %v609_v35, %v593_v15  ;;  %v599_v48 = vmul.f32 %v591_v40, %v547_v5 }
 0x52f   :  { %v616_v53 = vmul.f32 %v608_v39, %v592_v16  ;;  %v598_v54 = vmul.f32 %v590_v44, %v544_v50  ;;  %v588_v55 = vsub.f32 2.0, %v580_v43 }
 0x530   :  { %v625_v62 = vmul.f32 %v3941_v34, %v617_v45  ;;  %v607_v3 = vsub.f32 2.0, %v599_v48 }
 0x531   :  { %v606_v57 = vsub.f32 2.0, %v598_v54  ;;  %v596_v59 = vmul.f32 %v3458_v33, %v588_v55  ;;  %v624_v60 = vmul.f32 %v3943_v38, %v616_v53 }
 0x532   :  { %v615_v50 = vmul.f32 %v607_v3, %v591_v40 }
 0x533   :  { %v614_v22 = vmul.f32 %v606_v57, %v590_v44  ;;  %v604_v19 = vmul.f32 %v596_v59, %v562_v7  ;;  %3053 = vmatprep.mubr.msk.f32.mxu1 %vm493_vm8, %v624_v60  ;;  %v565_v7 = vpop.xlane.xlu1 %564 }
 0x534   :  { %3054 = vmatmul.mubr.msk.f32.vlgmr.msra.gmra.mrb[6].mxu1 %vm493_vm8, %v625_v62  ;;  %v623_v38 = vmul.f32 %v3949_v46, %v615_v50  ;;  %3459 = vrcp.f32 %v565_v7  ;;  %v1441_v50 = vld [vmem:[#allocation7 + $0x78] sm:$0xff] }
 0x535   :  { %v612_v4 = vsub.f32 2.0, %v604_v19  ;;  %3284 = vmatpush3.bf16.msra.mxu1 %v3801_v36  ;;  %v622_v5 = vmul.f32 %v3951_v51, %v614_v22  ;;  %v1438_v22 = vld [vmem:[#allocation7 + $0x60] sm:$0xff]  ;;  %v1439_v19 = vld [vmem:[#allocation7 + $0x68] sm:$0xff] }
 0x537   :  { %v620_v8 = vmul.f32 %v612_v4, %v596_v59  ;;  %3060 = vmatprep.mubr.msk.f32.mxu1 %vm493_vm8, %v622_v5  ;;  %v1440_v4 = vld [vmem:[#allocation7 + $0x70] sm:$0xff]  ;;  %v3317_v5 = vpack.c.bf16 %v1439_v19, %v1438_v22 }
 0x539   :  { %v628_v34 = vmul.f32 %v3968_v2, %v620_v8  ;;  %v4018_v8 = vld [vmem:[#allocation6] sm:$0xff] }
 0x53c   :  { %3061 = vmatmul.mubr.msk.f32.vlgmr.msra.gmra.mrb[6].mxu1 %vm493_vm8, %v623_v38  ;;  %v1347_v38 = vld [vmem:[#allocation7 + $0x40] sm:$0xff] }
 0x53d   :  { %3096 = vmatprep.mubr.msk.f32.mxu1 %vm493_vm8, %v628_v34  ;;  %v3321_v34 = vpack.c.bf16 %v1441_v50, %v1440_v4 }
 0x53e   :  { %v3460_v9 = vpop.eup %3459 }
 0x53f   :  { %v581_v10 = vmul.f32 %v3460_v9, %v565_v7 }
 0x541   :  { %v589_v63 = vsub.f32 2.0, %v581_v10 }
 0x543   :  { %v597_v36 = vmul.f32 %v3460_v9, %v589_v63  ;;  %v1349_v9 = vld [vmem:[#allocation7 + $0x50] sm:$0xff]  ;;  %v1350_v63 = vld [vmem:[#allocation7 + $0x58] sm:$0xff] }
 0x545   :  { %v605_v12 = vmul.f32 %v597_v36, %v565_v7  ;;  %v1348_v7 = vld [vmem:[#allocation7 + $0x48] sm:$0xff] }
 0x546   :  { %v3309_v10 = vpack.c.bf16 %v1348_v7, %v1347_v38  ;;  %v1343_v38 = vstv %s2791_s29 }
 0x547   :  { %v613_v13 = vsub.f32 2.0, %v605_v12 }
 0x548   :  { %3310 = vmatprep.subr.bf16.mxu0 %v3309_v10 }
 0x549   :  { %v621_v6 = vmul.f32 %v613_v13, %v597_v36  ;;  %v3313_v36 = vpack.c.bf16 %v1350_v63, %v1349_v9  ;;  %3312 = vmatpush3.bf16.msra.mxu0 %v3309_v10  ;;  %v2795_v10 = vld [vmem:[%s4306_s7 + $0x3] ss:$0 sm:$0xff] }
 0x54b   :  { %v629_v2 = vmul.f32 %v3965_v61, %v621_v6  ;;  %3314 = vmatprep.subr.bf16.mxu0 %v3313_v36 }
 0x54d   :  { %3316 = vmatpush3.bf16.msra.mxu0 %v3313_v36 }
 0x565   :  { %v3080_v11 = vpop.f32.mrb[12].mxu0 }
 0x566   :  { %v1103_v51 = vpop.f32.mrb[13].mxu0 }
 0x56d   :  { %v3091_v14 = vpop.f32.mrb[14].mxu0 }
 0x56e   :  { %v1185_v15 = vpop.f32.mrb[15].mxu0 }
 0x56f   :  { %v3305_v46 = vpack.c.bf16 %v3091_v14, %v1185_v15 }
 0x571   :  { %3306 = vmatprep.subr.bf16.mxu1 %v3305_v46 }
 0x572   :  { %3308 = vmatpush3.bf16.msra.mxu1 %v3305_v46 }
 0x573   :  { %3318 = vmatprep.subr.bf16.mxu1 %v3317_v5 }
 0x575   :  { %3097 = vmatmul.mubr.msk.f32.vlgmr.msra.gmra.mrb[8].mxu1 %vm493_vm8, %v629_v2 }
 0x576   :  { %3118 = vmatprep.mubr.msk.f32.mxu1 %vm107_vm0, %v4018_v8  ;;  %3320 = vmatpush3.bf16.msra.mxu1 %v3317_v5 }
 0x577   :  { %3322 = vmatprep.subr.bf16.mxu1 %v3321_v34 }
 0x57a   :  { %3324 = vmatpush3.bf16.msra.mxu1 %v3321_v34 }
 0x60f   :  { %v3062_v16 = vpop.f32.mrb[6].mxu1 }
 0x610   :  { %v3403_v24 = vadd.f32 %v3080_v11, %v3062_v16  ;;  %v942_v25 = vpop.f32.mrb[7].mxu1  ;;  %v4022_v11 = vld [vmem:[#allocation6 + $0x8] sm:$0xff] }
 0x611   :  { %v3405_v27 = vadd.f32 %v1103_v51, %v942_v25  ;;  %3119 = vmatmul.mubr.msk.f32.vlgmr.msra.gmra.mrb[10].mxu1 %vm107_vm0, %v4022_v11 }
 0x612   :  { %3145 = vmatprep.mubr.msk.f32.mxu1 %vm107_vm0, %v4018_v8 }
 0x648   :  { %v3098_v28 = vpop.f32.mrb[8].mxu1 }
 0x649   :  { %v3404_v33 = vadd.f32 %v3403_v24, %v3098_v28  ;;  %v1266_v35 = vpop.f32.mrb[9].mxu1 }
 0x64a   :  { %v3406_v40 = vadd.f32 %v3405_v27, %v1266_v35 }
 0x64b   :  { %v1283_v39 = vadd.f32 %v3404_v33, %v2789_v31 }
 0x64c   :  { %v1282_v44 = vadd.f32 %v3406_v40, %v2789_v31 }
 0x64d   :  { %v3997_v43 = vadd.f32 %v1283_v39, %v3697_v1 }
 0x64e   :  { %v4000_v61 = vadd.f32 %v1282_v44, %v3692_v0 }
 0x64f   :  { %v1291_v45 = vsel %vm107_vm0, %v3997_v43, 0.0 }
 0x650   :  { %1292 = vadd.xlane.f32.xlu1 %v1291_v45  ;;  %v1288_v48 = vsel %vm107_vm0, %v4000_v61, 0.0 }
 0x651   :  { %1289 = vadd.xlane.f32.xlu0 %v1288_v48 }
 0x6dd   :  { %v1293_v53 = vpop.xlane.xlu1 %1292 }
 0x6de   :  { %v1295_v54 = vmul.f32 0.03125, %v1293_v53  ;;  %v1290_v55 = vpop.xlane.xlu0 %1289 }
 0x6df   :  { %v1294_v57 = vmul.f32 0.03125, %v1290_v55 }
 0x6e0   :  { %v4007_v59 = vsub.f32 %v3997_v43, %v1295_v54 }
 0x6e1   :  { %v4010_v1 = vsub.f32 %v4000_v61, %v1294_v57 }
 0x6e2   :  { %v1299_v0 = vmul.f32 %v4007_v59, %v4007_v59 }
 0x6e3   :  { %v1298_v60 = vmul.f32 %v4010_v1, %v4010_v1 }
 0x6e4   :  { %v1303_v62 = vsel %vm107_vm0, %v1299_v0, 0.0  ;;  %v1308_v0 = vstv %s2790_s26  ;;  %v3120_v63 = vpop.f32.mrb[10].mxu1 }
 0x6e5   :  { %1304 = vadd.xlane.f32.xlu1 %v1303_v62  ;;  %v1300_v3 = vsel %vm107_vm0, %v1298_v60, 0.0  ;;  %v1310_v22 = vmul.f32 %v1308_v0, %v4007_v59  ;;  %v1309_v4 = vmul.f32 %v1308_v0, %v4010_v1  ;;  %v1525_v36 = vadd.f32 %v3120_v63, %v2795_v10  ;;  %v1519_v59 = vpop.f32.mrb[11].mxu1  ;;  %v2792_v1 = vld [vmem:[%s4306_s7 + $0x2] ss:$0 sm:$0xff] }
 0x6e6   :  { %1301 = vadd.xlane.f32.xlu0 %v1300_v3 }
 0x772   :  { %v1305_v51 = vpop.xlane.xlu1 %1304 }
 0x773   :  { %v1307_v12 = vmul.f32 0.032258064, %v1305_v51  ;;  %v1302_v13 = vpop.xlane.xlu0 %1301  ;;  %v1520_v51 = vadd.f32 %v2795_v10, %v1519_v59 }
 0x774   :  { %v1306_v14 = vmul.f32 0.032258064, %v1302_v13 }
 0x775   :  { %3461 = vrsqrt.f32 %v1307_v12  ;;  %vm1320_vm15 = vcmp.eq.f32.partialorder %v1307_v12, inf  ;;  %v1323_v2 = vand.u32 2147483648, %v1307_v12  ;;  %vm1322_vm1 = vcmp.eq.f32.partialorder %v1307_v12, 0.0 }
 0x776   :  { %3463 = vrsqrt.f32 %v1306_v14  ;;  %vm1313_vm2 = vcmp.eq.f32.partialorder %v1306_v14, inf  ;;  %v1316_v25 = vand.u32 2147483648, %v1306_v14  ;;  %vm1315_vm3 = vcmp.eq.f32.partialorder %v1306_v14, 0.0 }
 0x77f   :  { %v3462_v15 = vpop.eup %3461 }
 0x780   :  { %v3464_v6 = vpop.eup %3463  ;;  %v1319_v46 = vmul.f32 %v3462_v15, %v1307_v12 }
 0x781   :  { %v1312_v16 = vmul.f32 %v3464_v6, %v1306_v14 }
 0x782   :  { %v1321_v24 = vsel %vm1320_vm15, %v1307_v12, %v1319_v46  ;;  %v3325_v12 = vpack.c.bf16 %v1525_v36, %v1520_v51 }
 0x783   :  { %v1314_v27 = vsel %vm1313_vm2, %v1306_v14, %v1312_v16  ;;  %v1324_v28 = vsel %vm1322_vm1, %v1323_v2, %v1321_v24 }
 0x784   :  { %v1317_v31 = vsel %vm1315_vm3, %v1316_v25, %v1314_v27  ;;  %v1326_v33 = vadd.f32 1e-06, %v1324_v28  ;;  %3327 = vmatprep.subr.msk.bf16.mxu0 %vm3780_vm5, %v3325_v12  ;;  %v2814_v27 = vld [vmem:[%s4303_s4 + $0xa0] sm:$0xff]  ;;  %v2815_v28 = vld [vmem:[%s4303_s4 + $0xa8] sm:$0xff] }
 0x785   :  { %v1325_v35 = vadd.f32 1e-06, %v1317_v31  ;;  %v2824_v31 = vld [vmem:[%s4303_s4 + $0xc0] sm:$0xff] }
 0x786   :  { %3465 = vrcp.f32 %v1326_v33 }
 0x787   :  { %3467 = vrcp.f32 %v1325_v35 }
 0x790   :  { %v3466_v40 = vpop.eup %3465 }
 0x791   :  { %v3468_v39 = vpop.eup %3467  ;;  %v1330_v44 = vmul.f32 %v3466_v40, %v1326_v33 }
 0x792   :  { %v1329_v45 = vmul.f32 %v3468_v39, %v1325_v35 }
 0x793   :  { %v1332_v48 = vsub.f32 2.0, %v1330_v44 }
 0x794   :  { %v1331_v53 = vsub.f32 2.0, %v1329_v45  ;;  %v3339_v45 = vpack.c.bf16 %v2815_v28, %v2814_v27 }
 0x795   :  { %v1334_v54 = vmul.f32 %v3466_v40, %v1332_v48  ;;  %v2827_v40 = vld [vmem:[%s4303_s4 + $0xd8] sm:$0xff]  ;;  %v2816_v48 = vld [vmem:[%s4303_s4 + $0xb0] sm:$0xff] }
 0x796   :  { %v1333_v55 = vmul.f32 %v3468_v39, %v1331_v53  ;;  %v2817_v53 = vld [vmem:[%s4303_s4 + $0xb8] sm:$0xff] }
 0x797   :  { %v1336_v57 = vmul.f32 %v1334_v54, %v1326_v33  ;;  %v2825_v33 = vld [vmem:[%s4303_s4 + $0xc8] sm:$0xff] }
 0x798   :  { %v1335_v60 = vmul.f32 %v1333_v55, %v1325_v35  ;;  %v2826_v35 = vld [vmem:[%s4303_s4 + $0xd0] sm:$0xff]  ;;  %v3355_v39 = vpack.c.bf16 %v2825_v33, %v2824_v31 }
 0x799   :  { %v1338_v62 = vsub.f32 2.0, %v1336_v57  ;;  %v3359_v44 = vpack.c.bf16 %v2827_v40, %v2826_v35  ;;  %v3343_v57 = vpack.c.bf16 %v2817_v53, %v2816_v48 }
 0x79a   :  { %v1337_v3 = vsub.f32 2.0, %v1335_v60  ;;  %v2834_v60 = vld [vmem:[%s4303_s4 + $0xf0] sm:$0xff] }
 0x79b   :  { %v1340_v19 = vmul.f32 %v1338_v62, %v1334_v54  ;;  %v2832_v54 = vld [vmem:[%s4303_s4 + $0xe0] sm:$0xff]  ;;  %v2835_v62 = vld [vmem:[%s4303_s4 + $0xf8] sm:$0xff] }
 0x79c   :  { %v1339_v5 = vmul.f32 %v1337_v3, %v1333_v55  ;;  %v2833_v55 = vld [vmem:[%s4303_s4 + $0xe8] sm:$0xff]  ;;  %v3371_v3 = vpack.c.bf16 %v2835_v62, %v2834_v60 }
 0x79d   :  { %v1342_v50 = vmul.f32 %v1340_v19, %v1310_v22  ;;  %v3367_v0 = vpack.c.bf16 %v2833_v55, %v2832_v54 }
 0x79e   :  { %v1341_v34 = vmul.f32 %v1339_v5, %v1309_v4 }
 0x79f   :  { %v1345_v9 = vadd.f32 %v1343_v38, %v1342_v50 }
 0x7a0   :  { %v1344_v7 = vadd.f32 %v1343_v38, %v1341_v34 }
 0x7a2   :  { %3107 = vmatprep.mubr.msk.f32.mxu0 %vm107_vm0, %v1344_v7 }
 0x7a3   :  { %3108 = vmatmul.mubr.msk.f32.vlgmr.msra.gmra.mrb[16].mxu0 %vm107_vm0, %v1345_v9 }
 0x7a4   :  { %3330 = vmatpush3.bf16.xpose.msk.msra.mxu0 %vm3780_vm5, %v3325_v12 }
 0x7a5   :  { %3356 = vmatprep.subr.bf16.mxu0 %v3355_v39 }
 0x876   :  { %v3109_v13 = vpop.f32.mrb[16].mxu0 }
 0x877   :  { %v1434_v14 = vadd.f32 %v3109_v13, %v2792_v1  ;;  %v1428_v15 = vpop.f32.mrb[17].mxu0 }
 0x878   :  { %v1429_v6 = vadd.f32 %v2792_v1, %v1428_v15 }
 0x879   :  { %v1529_v2 = vmul.f32 %v1434_v14, %v3793_v32  ;;  %v1531_v26 = vmul.f32 %v1434_v14, %v3813_v41  ;;  %v2808_v41 = vld [vmem:[%s4303_s4 + $0x80] sm:$0xff] }
 0x87a   :  { %v1528_v46 = vmul.f32 %v1429_v6, %v3770_v21  ;;  %v1530_v16 = vmul.f32 %v1429_v6, %v3806_v37  ;;  %v1532_v24 = vmul.f32 %v1429_v6, %v3819_v42  ;;  %v1533_v21 = vmul.f32 %v1434_v14, %v3827_v47  ;;  %v2809_v42 = vld [vmem:[%s4303_s4 + $0x88] sm:$0xff]  ;;  %v2810_v47 = vld [vmem:[%s4303_s4 + $0x90] sm:$0xff] }
 0x87b   :  { %v1534_v32 = vmul.f32 %v1429_v6, %v3833_v49  ;;  %v1535_v37 = vmul.f32 %v1434_v14, %v3841_v52  ;;  %v3331_v49 = vpack.c.bf16 %v2809_v42, %v2808_v41  ;;  %v2811_v52 = vld [vmem:[%s4303_s4 + $0x98] sm:$0xff] }
 0x87c   :  { %3125 = vmatprep.mubr.msk.f32.mxu0 %vm107_vm0, %v1528_v46  ;;  %v3335_v25 = vpack.c.bf16 %v2811_v52, %v2810_v47 }
 0x87d   :  { %3126 = vmatmul.mubr.msk.f32.vlgmr.msra.gmra.mrb[18].mxu0 %vm107_vm0, %v1529_v2  ;;  %3332 = vmatprep.subr.bf16.mxu1 %v3331_v49 }
 0x87e   :  { %3128 = vmatprep.mubr.msk.f32.mxu0 %vm107_vm0, %v1530_v16  ;;  %3334 = vmatpush3.bf16.msra.mxu1 %v3331_v49 }
 0x87f   :  { %3336 = vmatprep.subr.bf16.mxu1 %v3335_v25  ;;  %3358 = vmatpush3.bf16.msra.mxu0 %v3355_v39 }
 0x880   :  { %3360 = vmatprep.subr.bf16.mxu0 %v3359_v44 }
 0x881   :  { %3129 = vmatmul.mubr.msk.f32.gmra.mrb[20].mxu0 %vm107_vm0, %v1531_v26 }
 0x882   :  { %3131 = vmatprep.mubr.msk.f32.mxu0 %vm107_vm0, %v1532_v24  ;;  %3338 = vmatpush3.bf16.msra.mxu1 %v3335_v25 }
 0x883   :  { %3340 = vmatprep.subr.bf16.mxu1 %v3339_v45  ;;  %3362 = vmatpush3.bf16.msra.mxu0 %v3359_v44 }
 0x884   :  { %3368 = vmatprep.subr.bf16.mxu0 %v3367_v0 }
 0x885   :  { %3132 = vmatmul.mubr.msk.f32.gmra.mrb[22].mxu0 %vm107_vm0, %v1533_v21  ;;  %3146 = vmatmul.mubr.msk.f32.vlgmr.msra.gmra.mrb[12].mxu1 %vm107_vm0, %v4022_v11 }
 0x886   :  { %3134 = vmatprep.mubr.msk.f32.mxu0 %vm107_vm0, %v1534_v32  ;;  %3342 = vmatpush3.bf16.msra.mxu1 %v3339_v45 }
 0x887   :  { %3156 = vmatprep.mubr.msk.f32.mxu1 %vm107_vm0, %v4018_v8  ;;  %3344 = vmatprep.subr.bf16.mxu1 %v3343_v57 }
 0x889   :  { %3135 = vmatmul.mubr.msk.f32.gmra.mrb[24].mxu0 %vm107_vm0, %v1535_v37 }
 0x88a   :  { %3181 = vmatprep.mubr.msk.f32.mxu0 %vm107_vm0, %v4018_v8  ;;  %3346 = vmatpush3.bf16.msra.mxu1 %v3343_v57 }
 0x88d   :  { %3182 = vmatmul.mubr.msk.f32.vlgmr.msra.gmra.mrb[26].mxu0 %vm107_vm0, %v4022_v11  ;;  %3157 = vmatmul.mubr.msk.f32.vlgmr.msra.gmra.mrb[14].mxu1 %vm107_vm0, %v4022_v11 }
 0x88e   :  { %3370 = vmatpush3.bf16.msra.mxu0 %v3367_v0  ;;  %3199 = vmatprep.mubr.msk.f32.mxu0 %vm107_vm0, %v4018_v8 }
 0x88f   :  { %3372 = vmatprep.subr.bf16.mxu0 %v3371_v3 }
 0x892   :  { %3374 = vmatpush3.bf16.msra.mxu0 %v3371_v3 }
 0x895   :  { %3200 = vmatmul.mubr.msk.f32.vlgmr.msra.gmra.mrb[28].mxu0 %vm107_vm0, %v4022_v11 }
 0x950   :  { %v3127_v22 = vpop.f32.mrb[18].mxu0 }
 0x951   :  { %v1632_v19 = vpop.f32.mrb[19].mxu0  ;;  %v1672_v34 = vsel %vm98_vm11, %v3127_v22, -1e+30 }
 0x952   :  { %v1671_v11 = vsel %vm97_vm12, %v1632_v19, -1e+30  ;;  %v1682_v17 = vsel %vm493_vm8, %v1672_v34, -inf }
 0x953   :  { %v1679_v63 = vsel %vm493_vm8, %v1671_v11, -inf }
 0x954   :  { %v3130_v4 = vpop.f32.mrb[20].mxu0 }
 0x955   :  { %v1674_v5 = vsel %vm100_vm9, %v3130_v4, -1e+30  ;;  %v1642_v50 = vpop.f32.mrb[21].mxu0 }
 0x956   :  { %v1673_v38 = vsel %vm99_vm10, %v1642_v50, -1e+30  ;;  %v1688_v8 = vsel %vm493_vm8, %v1674_v5, -inf }
 0x957   :  { %1689 = vmax.xlane.f32.xlu1 %v1688_v8  ;;  %v1685_v7 = vsel %vm493_vm8, %v1673_v38, -inf }
 0x958   :  { %1686 = vmax.xlane.f32.xlu0 %v1685_v7  ;;  %v3133_v9 = vpop.f32.mrb[22].mxu0  ;;  %v3147_v4 = vpop.f32.mrb[12].mxu1 }
 0x959   :  { %v1652_v10 = vpop.f32.mrb[23].mxu0  ;;  %v1676_v18 = vsel %vm102_vm6, %v3133_v9, -1e+30 }
 0x95a   :  { %v1675_v20 = vsel %vm101_vm7, %v1652_v10, -1e+30  ;;  %v1694_v23 = vsel %vm493_vm8, %v1676_v18, -inf }
 0x95b   :  { %1683 = vmax.xlane.f32.xlu1 %v1682_v17  ;;  %v1691_v12 = vsel %vm493_vm8, %v1675_v20, -inf }
 0x95c   :  { %1680 = vmax.xlane.f32.xlu0 %v1679_v63  ;;  %v3136_v36 = vpop.f32.mrb[24].mxu0 }
 0x95d   :  { %v1662_v59 = vpop.f32.mrb[25].mxu0  ;;  %v1678_v51 = vsel %vm104_vm13, %v3136_v36, -1e+30 }
 0x95e   :  { %v1677_v56 = vsel %vm103_vm14, %v1662_v59, -1e+30  ;;  %v1700_v1 = vsel %vm493_vm8, %v1678_v51, -inf }
 0x95f   :  { %1695 = vmax.xlane.f32.xlu1 %v1694_v23  ;;  %v1697_v58 = vsel %vm493_vm8, %v1677_v56, -inf }
 0x960   :  { %1692 = vmax.xlane.f32.xlu0 %v1691_v12  ;;  %v3183_v7 = vpop.f32.mrb[26].mxu0 }
 0x963   :  { %1701 = vmax.xlane.f32.xlu1 %v1700_v1 }
 0x964   :  { %1698 = vmax.xlane.f32.xlu0 %v1697_v58 }
 0x9e4   :  { %v1690_v13 = vpop.xlane.xlu1 %1689 }
 0x9e5   :  { %v1706_v14 = vsub.f32 %v1674_v5, %v1690_v13  ;;  %v1687_v15 = vpop.xlane.xlu0 %1686  ;;  %v1886_v5 = vpop.f32.mrb[13].mxu1 }
 0x9e6   :  { %v1705_v6 = vsub.f32 %v1673_v38, %v1687_v15  ;;  %v3158_v50 = vpop.f32.mrb[14].mxu1 }
 0x9e7   :  { %v1717_v46 = vmul.f32 1.442695, %v1706_v14  ;;  %v1966_v38 = vpop.f32.mrb[15].mxu1 }
 0x9e8   :  { %v1715_v29 = vmul.f32 1.442695, %v1705_v6  ;;  %v1684_v2 = vpop.xlane.xlu1 %1683  ;;  %v3347_v8 = vpack.c.bf16 %v3158_v50, %v1966_v38 }
 0x9e9   :  { %3469 = vpow2.f32 %v1717_v46  ;;  %v1704_v16 = vsub.f32 %v1672_v34, %v1684_v2  ;;  %v1681_v26 = vpop.xlane.xlu0 %1680  ;;  %v4176_v34 = vpack.c.bf16 %v3147_v4, %v1886_v5 }
 0x9ea   :  { %3471 = vpow2.f32 %v1715_v29  ;;  %v1703_v30 = vsub.f32 %v1671_v11, %v1681_v26  ;;  %3348 = vmatprep.subr.bf16.mxu1 %v3347_v8  ;;  %v2208_v11 = vpop.f32.mrb[27].mxu0 }
 0x9eb   :  { %v1713_v24 = vmul.f32 1.442695, %v1704_v16  ;;  %3350 = vmatpush3.bf16.msra.mxu1 %v3347_v8  ;;  %v4179_v9 = vpack.c.bf16 %v3183_v7, %v2208_v11  ;;  %v3201_v10 = vpop.f32.mrb[28].mxu0 }
 0x9ec   :  { %v1711_v21 = vmul.f32 1.442695, %v1703_v30  ;;  %v1696_v32 = vpop.xlane.xlu1 %1695  ;;  %3352 = vmatprep.subr.bf16.mxu1 %v4176_v34  ;;  %v2371_v17 = vpop.f32.mrb[29].mxu0 }
 0x9ed   :  { %3473 = vpow2.f32 %v1713_v24  ;;  %v1708_v37 = vsub.f32 %v1676_v18, %v1696_v32  ;;  %v1693_v41 = vpop.xlane.xlu0 %1692  ;;  %v4181_v18 = vpack.c.bf16 %v3201_v10, %v2371_v17 }
 0x9ee   :  { %3475 = vpow2.f32 %v1711_v21  ;;  %v1707_v42 = vsub.f32 %v1675_v20, %v1693_v41 }
 0x9ef   :  { %v1721_v47 = vmul.f32 1.442695, %v1708_v37 }
 0x9f0   :  { %v1719_v49 = vmul.f32 1.442695, %v1707_v42  ;;  %v1702_v52 = vpop.xlane.xlu1 %1701 }
 0x9f1   :  { %3477 = vpow2.f32 %v1721_v47  ;;  %v1710_v25 = vsub.f32 %v1678_v51, %v1702_v52  ;;  %v1699_v27 = vpop.xlane.xlu0 %1698 }
 0x9f2   :  { %3479 = vpow2.f32 %v1719_v49  ;;  %v1709_v28 = vsub.f32 %v1677_v56, %v1699_v27 }
 0x9f3   :  { %v4144_v31 = vpop.eup %3469  ;;  %v1725_v33 = vmul.f32 1.442695, %v1710_v25 }
 0x9f4   :  { %v4146_v35 = vpop.eup %3471  ;;  %v1723_v40 = vmul.f32 1.442695, %v1709_v28  ;;  %v1736_v39 = vsel %vm493_vm8, %v4144_v31, 0.0 }
 0x9f5   :  { %3481 = vpow2.f32 %v1725_v33  ;;  %1737 = vadd.xlane.f32.xlu1 %v1736_v39  ;;  %v1733_v44 = vsel %vm493_vm8, %v4146_v35, 0.0 }
 0x9f6   :  { %3483 = vpow2.f32 %v1723_v40  ;;  %1734 = vadd.xlane.f32.xlu0 %v1733_v44 }
 0x9f7   :  { %v4152_v45 = vpop.eup %3473 }
 0x9f8   :  { %v4154_v48 = vpop.eup %3475  ;;  %v1730_v53 = vsel %vm493_vm8, %v4152_v45, 0.0 }
 0x9f9   :  { %1731 = vadd.xlane.f32.xlu1 %v1730_v53  ;;  %v1727_v54 = vsel %vm493_vm8, %v4154_v48, 0.0 }
 0x9fa   :  { %1728 = vadd.xlane.f32.xlu0 %v1727_v54 }
 0x9fb   :  { %v4160_v55 = vpop.eup %3477 }
 0x9fc   :  { %v4162_v57 = vpop.eup %3479  ;;  %v1742_v0 = vsel %vm493_vm8, %v4160_v55, 0.0 }
 0x9fd   :  { %1743 = vadd.xlane.f32.xlu1 %v1742_v0  ;;  %v1739_v60 = vsel %vm493_vm8, %v4162_v57, 0.0 }
 0x9fe   :  { %1740 = vadd.xlane.f32.xlu0 %v1739_v60 }
 0x9ff   :  { %v4168_v62 = vpop.eup %3481 }
 0xa00   :  { %v4170_v3 = vpop.eup %3483  ;;  %v1748_v22 = vsel %vm493_vm8, %v4168_v62, 0.0 }
 0xa01   :  { %1749 = vadd.xlane.f32.xlu1 %v1748_v22  ;;  %v1745_v19 = vsel %vm493_vm8, %v4170_v3, 0.0 }
 0xa02   :  { %1746 = vadd.xlane.f32.xlu0 %v1745_v19 }
 0xa82   :  { %v1738_v63 = vpop.xlane.xlu1 %1737 }
 0xa83   :  { %3485 = vrcp.f32 %v1738_v63  ;;  %v1735_v20 = vpop.xlane.xlu0 %1734 }
 0xa84   :  { %3487 = vrcp.f32 %v1735_v20 }
 0xa86   :  { %v1732_v36 = vpop.xlane.xlu1 %1731 }
 0xa87   :  { %3489 = vrcp.f32 %v1732_v36  ;;  %v1729_v59 = vpop.xlane.xlu0 %1728 }
 0xa88   :  { %3491 = vrcp.f32 %v1729_v59 }
 0xa8a   :  { %v1744_v23 = vpop.xlane.xlu1 %1743 }
 0xa8b   :  { %3493 = vrcp.f32 %v1744_v23  ;;  %v1741_v51 = vpop.xlane.xlu0 %1740 }
 0xa8c   :  { %3495 = vrcp.f32 %v1741_v51 }
 0xa8d   :  { %v3486_v12 = vpop.eup %3485 }
 0xa8e   :  { %v3488_v56 = vpop.eup %3487  ;;  %v1762_v1 = vmul.f32 %v3486_v12, %v1738_v63  ;;  %v4183_v58 = vpop.xlane.xlu1 %1749 }
 0xa8f   :  { %v1761_v13 = vmul.f32 %v3488_v56, %v1735_v20  ;;  %3497 = vrcp.f32 %v4183_v58  ;;  %v1747_v14 = vpop.xlane.xlu0 %1746 }
 0xa90   :  { %v1770_v15 = vsub.f32 2.0, %v1762_v1  ;;  %3499 = vrcp.f32 %v1747_v14 }
 0xa91   :  { %v3490_v6 = vpop.eup %3489  ;;  %v1769_v46 = vsub.f32 2.0, %v1761_v13 }
 0xa92   :  { %v3492_v29 = vpop.eup %3491  ;;  %v1778_v2 = vmul.f32 %v3486_v12, %v1770_v15  ;;  %v1760_v16 = vmul.f32 %v3490_v6, %v1732_v36 }
 0xa93   :  { %v1777_v26 = vmul.f32 %v3488_v56, %v1769_v46  ;;  %v1759_v30 = vmul.f32 %v3492_v29, %v1729_v59 }
 0xa94   :  { %v1786_v24 = vmul.f32 %v1778_v2, %v1738_v63  ;;  %v1768_v21 = vsub.f32 2.0, %v1760_v16 }
 0xa95   :  { %v3494_v32 = vpop.eup %3493  ;;  %v1785_v37 = vmul.f32 %v1777_v26, %v1735_v20  ;;  %v1767_v41 = vsub.f32 2.0, %v1759_v30 }
 0xa96   :  { %v3496_v42 = vpop.eup %3495  ;;  %v1794_v47 = vsub.f32 2.0, %v1786_v24  ;;  %v1776_v49 = vmul.f32 %v3490_v6, %v1768_v21  ;;  %v1764_v52 = vmul.f32 %v3494_v32, %v1744_v23 }
 0xa97   :  { %v1793_v25 = vsub.f32 2.0, %v1785_v37  ;;  %v1775_v27 = vmul.f32 %v3492_v29, %v1767_v41  ;;  %v1763_v28 = vmul.f32 %v3496_v42, %v1741_v51 }
 0xa98   :  { %v1802_v33 = vmul.f32 %v1794_v47, %v1778_v2  ;;  %v1784_v40 = vmul.f32 %v1776_v49, %v1732_v36  ;;  %v1772_v39 = vsub.f32 2.0, %v1764_v52  ;;  %v2533_v52 = vld [vmem:[%s4304_s5 + $0x8] sm:$0xff] }
 0xa99   :  { %v3498_v44 = vpop.eup %3497  ;;  %v1801_v53 = vmul.f32 %v1793_v25, %v1777_v26  ;;  %v1783_v54 = vmul.f32 %v1775_v27, %v1729_v59  ;;  %v1771_v0 = vsub.f32 2.0, %v1763_v28  ;;  %v2534_v25 = vld [vmem:[%s4304_s5 + $0x10] sm:$0xff]  ;;  %v2535_v28 = vld [vmem:[%s4304_s5 + $0x18] sm:$0xff] }
 0xa9a   :  { %v3500_v60 = vpop.eup %3499  ;;  %v1810_v50 = vmul.f32 %v4144_v31, %v1802_v33  ;;  %v1792_v38 = vsub.f32 2.0, %v1784_v40  ;;  %v1780_v8 = vmul.f32 %v3494_v32, %v1772_v39  ;;  %v1766_v7 = vmul.f32 %v3498_v44, %v4183_v58  ;;  %v2624_v40 = vld [vmem:[%s4305_s6] sm:$0xff]  ;;  %v2625_v39 = vld [vmem:[%s4305_s6 + $0x8] sm:$0xff] }
 0xa9b   :  { %v1791_v22 = vsub.f32 2.0, %v1783_v54  ;;  %v1779_v19 = vmul.f32 %v3496_v42, %v1771_v0  ;;  %v1765_v4 = vmul.f32 %v3500_v60, %v1747_v14  ;;  %v1809_v5 = vmul.f32 %v4146_v35, %v1801_v53  ;;  %v2627_v54 = vld [vmem:[%s4305_s6 + $0x18] sm:$0xff] }
 0xa9c   :  { %v1800_v35 = vmul.f32 %v1792_v38, %v1776_v49  ;;  %v1788_v59 = vmul.f32 %v1780_v8, %v1744_v23  ;;  %v1774_v31 = vsub.f32 2.0, %v1766_v7  ;;  %v2532_v49 = vld [vmem:[%s4304_s5] sm:$0xff]  ;;  %v3383_v33 = vpack.c.bf16 %v2535_v28, %v2534_v25 }
 0xa9d   :  { %v1799_v11 = vmul.f32 %v1791_v22, %v1775_v27  ;;  %v1787_v10 = vmul.f32 %v1779_v19, %v1741_v51  ;;  %v1773_v17 = vsub.f32 2.0, %v1765_v4  ;;  %3163 = vmatprep.mubr.msk.f32.mxu1 %vm493_vm8, %v1809_v5  ;;  %v3379_v27 = vpack.c.bf16 %v2533_v52, %v2532_v49  ;;  %v2629_v22 = vld [vmem:[%s4305_s6 + $0x28] sm:$0xff]  ;;  %v2848_v25 = vld [vmem:[%s4306_s7 + $0x7] ss:$0 sm:$0xff] }
 0xa9e   :  { %3164 = vmatmul.mubr.msk.f32.vlgmr.msra.gmra.mrb[16].mxu1 %vm493_vm8, %v1810_v50  ;;  %v1808_v51 = vmul.f32 %v4152_v45, %v1800_v35  ;;  %v1796_v1 = vsub.f32 2.0, %v1788_v59  ;;  %v1782_v13 = vmul.f32 %v3498_v44, %v1774_v31  ;;  %v2626_v44 = vld [vmem:[%s4305_s6 + $0x10] sm:$0xff]  ;;  %v3387_v53 = vpack.c.bf16 %v2625_v39, %v2624_v40 }
 0xa9f   :  { %v1795_v63 = vsub.f32 2.0, %v1787_v10  ;;  %v1781_v20 = vmul.f32 %v3500_v60, %v1773_v17  ;;  %3354 = vmatpush3.bf16.msra.mxu1 %v4176_v34  ;;  %v1807_v36 = vmul.f32 %v4154_v48, %v1799_v11  ;;  %3380 = vmatprep.subr.bf16.mxu0 %v3379_v27  ;;  %v3391_v0 = vpack.c.bf16 %v2627_v54, %v2626_v44  ;;  %v2628_v60 = vld [vmem:[%s4305_s6 + $0x20] sm:$0xff] }
 0xaa0   :  { %3364 = vmatprep.subr.bf16.mxu1 %v4179_v9  ;;  %v1804_v48 = vmul.f32 %v1796_v1, %v1780_v8  ;;  %v1790_v34 = vmul.f32 %v1782_v13, %v4183_v58  ;;  %v2840_v58 = vld [vmem:[%s4306_s7 + $0x5] ss:$0 sm:$0xff]  ;;  %3382 = vmatpush3.bf16.msra.mxu0 %v3379_v27 }
 0xaa1   :  { %v1803_v12 = vmul.f32 %v1795_v63, %v1779_v19  ;;  %v1789_v56 = vmul.f32 %v1781_v20, %v1747_v14  ;;  %3170 = vmatprep.mubr.msk.f32.mxu1 %vm493_vm8, %v1807_v36  ;;  %3384 = vmatprep.subr.bf16.mxu0 %v3383_v33  ;;  %v3395_v19 = vpack.c.bf16 %v2629_v22, %v2628_v60 }
 0xaa2   :  { %v1812_v14 = vmul.f32 %v4160_v55, %v1804_v48  ;;  %v1798_v45 = vsub.f32 2.0, %v1790_v34 }
 0xaa3   :  { %v1797_v15 = vsub.f32 2.0, %v1789_v56  ;;  %v1811_v6 = vmul.f32 %v4162_v57, %v1803_v12 }
 0xaa4   :  { %v1806_v57 = vmul.f32 %v1798_v45, %v1782_v13  ;;  %3386 = vmatpush3.bf16.msra.mxu0 %v3383_v33 }
 0xaa5   :  { %v1805_v23 = vmul.f32 %v1797_v15, %v1781_v20 }
 0xaa6   :  { %3171 = vmatmul.mubr.msk.f32.vlgmr.msra.gmra.mrb[16].mxu1 %vm493_vm8, %v1808_v51 }
 0xaa7   :  { %3366 = vmatpush3.bf16.msra.mxu1 %v4179_v9  ;;  %3188 = vmatprep.mubr.msk.f32.mxu1 %vm493_vm8, %v1811_v6  ;;  %v1813_v46 = vmul.f32 %v4170_v3, %v1805_v23  ;;  %v1814_v9 = vmul.f32 %v4168_v62, %v1806_v57 }
 0xaa8   :  { %3376 = vmatprep.subr.bf16.mxu1 %v4181_v18 }
 0xaae   :  { %3189 = vmatmul.mubr.msk.f32.vlgmr.msra.gmra.mrb[16].mxu1 %vm493_vm8, %v1812_v14  ;;  %v2494_v14 = vstv %s2841_s18 }
 0xaaf   :  { %3378 = vmatpush3.bf16.msra.mxu1 %v4181_v18  ;;  %3206 = vmatprep.mubr.msk.f32.mxu1 %vm493_vm8, %v1813_v46 }
 0xab0   :  { %3388 = vmatprep.subr.bf16.mxu1 %v3387_v53 }
 0xab6   :  { %3207 = vmatmul.mubr.msk.f32.vlgmr.msra.gmra.mrb[16].mxu1 %vm493_vm8, %v1814_v9  ;;  %vm2632_vm8 = vcmask 523264  }
 0xab7   :  { %3390 = vmatpush3.bf16.msra.mxu1 %v3387_v53 }
 0xab8   :  { %3392 = vmatprep.subr.bf16.mxu1 %v3391_v0 }
 0xabb   :  { %3394 = vmatpush3.bf16.msra.mxu1 %v3391_v0 }
 0xabc   :  { %3396 = vmatprep.subr.bf16.mxu1 %v3395_v19 }
 0xabf   :  { %3398 = vmatpush3.bf16.msra.mxu1 %v3395_v19 }
 0xb89   :  { %v3208_v29 = vpop.f32.mrb[16].mxu1 }
 0xb8a   :  { %v2469_v55 = vadd.f32 %v3208_v29, %v2840_v58  ;;  %v2452_v2 = vpop.f32.mrb[17].mxu1 }
 0xb8b   :  { %v2468_v16 = vadd.f32 %v2840_v58, %v2452_v2 }
 0xb8c   :  { %v4213_v3 = vadd.f32 %v2469_v55, %v3997_v43 }
 0xb8d   :  { %v4216_v18 = vadd.f32 %v2468_v16, %v4000_v61  ;;  %v2529_v16 = vstv %s2842_s20 }
 0xb8e   :  { %v2477_v26 = vsel %vm107_vm0, %v4213_v3, 0.0 }
 0xb8f   :  { %2478 = vadd.xlane.f32.xlu1 %v2477_v26  ;;  %v2474_v62 = vsel %vm107_vm0, %v4216_v18, 0.0 }
 0xb90   :  { %2475 = vadd.xlane.f32.xlu0 %v2474_v62 }
 0xc1c   :  { %v2479_v30 = vpop.xlane.xlu1 %2478 }
 0xc1d   :  { %v2481_v24 = vmul.f32 0.03125, %v2479_v30  ;;  %v2476_v21 = vpop.xlane.xlu0 %2475 }
 0xc1e   :  { %v2480_v32 = vmul.f32 0.03125, %v2476_v21  ;;  %v2631_v21 = vld [vmem:[%s4305_s6 + $0x38] sm:$0xff] }
 0xc1f   :  { %v4223_v37 = vsub.f32 %v4213_v3, %v2481_v24  ;;  %v2630_v24 = vld [vmem:[%s4305_s6 + $0x30] sm:$0xff]  ;;  %s3600_s6 = smov [#allocation9]  }
 0xc20   :  { %v4226_v43 = vsub.f32 %v4216_v18, %v2480_v32  ;;  %v3399_v32 = vpack.c.bf16 %v2631_v21, %v2630_v24  ;;  %s2730_s0 = sshll.u32 %s3600_s6, 4  ;;  %s2731_s0 = int_to_ptr.vmem [resolvable:$true] %s2730_s0 }
 0xc21   :  { %v2485_v61 = vmul.f32 %v4223_v37, %v4223_v37  ;;  %v2496_v9 = vmul.f32 %v2494_v14, %v4223_v37  ;;  %v2843_v37 = vld [vmem:[%s4306_s7 + $0x6] ss:$0 sm:$0xff]  ;;  %s3565_s1 = scalar_lea.vmem %s2731_s0, 256  ;;  %p3570_p8 = scmp.lt.s32.totalorder %s2731_s0, %s2731_s0 }
 0xc22   :  { %v2484_v41 = vmul.f32 %v4226_v43, %v4226_v43  ;;  %v2495_v29 = vmul.f32 %v2494_v14, %v4226_v43  ;;  %3400 = vmatprep.subr.bf16.mxu1 %v3399_v32  ;;  %p3566_p7 = scmp.ne.s32.totalorder %s2731_s0, %s3565_s1  ;;  %p3571_p9 = scmp.lt.s32.totalorder %s3565_s1, %s3565_s1 }
 0xc23   :  { %v2489_v42 = vsel %vm107_vm0, %v2485_v61, 0.0  ;;  %3402 = vmatpush3.bf16.msra.mxu1 %v3399_v32 }
 0xc24   :  { %2490 = vadd.xlane.f32.xlu1 %v2489_v42  ;;  %v2486_v47 = vsel %vm107_vm0, %v2484_v41, 0.0  ;;  %p3572_p10 = por %p3571_p9, %p3570_p8 }
 0xc25   :  { %2487 = vadd.xlane.f32.xlu0 %v2486_v47 }
 0xc26   :  { %p3573_p11 = pnand %p3572_p10, %p3566_p7 }
 0xcb1   :  { %v2491_v4 = vpop.xlane.xlu1 %2490 }
 0xcb2   :  { %v2493_v5 = vmul.f32 0.032258064, %v2491_v4  ;;  %v2488_v50 = vpop.xlane.xlu0 %2487 }
 0xcb3   :  { %v2492_v38 = vmul.f32 0.032258064, %v2488_v50 }
 0xcb4   :  { %3501 = vrsqrt.f32 %v2493_v5  ;;  %vm2506_vm4 = vcmp.eq.f32.partialorder %v2493_v5, inf  ;;  %v2509_v10 = vand.u32 2147483648, %v2493_v5  ;;  %vm2508_vm5 = vcmp.eq.f32.partialorder %v2493_v5, 0.0 }
 0xcb5   :  { %3503 = vrsqrt.f32 %v2492_v38  ;;  %vm2499_vm6 = vcmp.eq.f32.partialorder %v2492_v38, inf  ;;  %v2502_v20 = vand.u32 2147483648, %v2492_v38  ;;  %vm2501_vm7 = vcmp.eq.f32.partialorder %v2492_v38, 0.0 }
 0xcbe   :  { %v3502_v8 = vpop.eup %3501 }
 0xcbf   :  { %v3504_v7 = vpop.eup %3503  ;;  %v2505_v11 = vmul.f32 %v3502_v8, %v2493_v5 }
 0xcc0   :  { %v2498_v17 = vmul.f32 %v3504_v7, %v2492_v38 }
 0xcc1   :  { %v2507_v63 = vsel %vm2506_vm4, %v2493_v5, %v2505_v11 }
 0xcc2   :  { %v2510_v36 = vsel %vm2508_vm5, %v2509_v10, %v2507_v63  ;;  %v2500_v35 = vsel %vm2499_vm6, %v2492_v38, %v2498_v17 }
 0xcc3   :  { %v2512_v59 = vadd.f32 1e-06, %v2510_v36  ;;  %v2503_v31 = vsel %vm2501_vm7, %v2502_v20, %v2500_v35 }
 0xcc4   :  { %v2511_v12 = vadd.f32 1e-06, %v2503_v31 }
 0xcc5   :  { %3505 = vrcp.f32 %v2512_v59 }
 0xcc6   :  { %3507 = vrcp.f32 %v2511_v12 }
 0xccf   :  { %v3506_v56 = vpop.eup %3505 }
 0xcd0   :  { %v3508_v51 = vpop.eup %3507  ;;  %v2516_v1 = vmul.f32 %v3506_v56, %v2512_v59 }
 0xcd1   :  { %v2515_v13 = vmul.f32 %v3508_v51, %v2511_v12 }
 0xcd2   :  { %v2518_v15 = vsub.f32 2.0, %v2516_v1 }
 0xcd3   :  { %v2517_v6 = vsub.f32 2.0, %v2515_v13 }
 0xcd4   :  { %v2520_v48 = vmul.f32 %v3506_v56, %v2518_v15 }
 0xcd5   :  { %v2519_v34 = vmul.f32 %v3508_v51, %v2517_v6 }
 0xcd6   :  { %v2522_v23 = vmul.f32 %v2520_v48, %v2512_v59 }
 0xcd7   :  { %v2521_v45 = vmul.f32 %v2519_v34, %v2511_v12 }
 0xcd8   :  { %v2524_v46 = vsub.f32 2.0, %v2522_v23 }
 0xcd9   :  { %v2523_v57 = vsub.f32 2.0, %v2521_v45 }
 0xcda   :  { %v2526_v58 = vmul.f32 %v2524_v46, %v2520_v48 }
 0xcdb   :  { %v2525_v55 = vmul.f32 %v2523_v57, %v2519_v34 }
 0xcdc   :  { %v2528_v2 = vmul.f32 %v2526_v58, %v2496_v9 }
 0xcdd   :  { %v2527_v26 = vmul.f32 %v2525_v55, %v2495_v29 }
 0xcde   :  { %v2531_v30 = vadd.f32 %v2529_v16, %v2528_v2 }
 0xcdf   :  { %v2530_v62 = vadd.f32 %v2529_v16, %v2527_v26 }
 0xce1   :  { %3217 = vmatprep.mubr.msk.f32.mxu0 %vm107_vm0, %v2530_v62 }
 0xce2   :  { %3218 = vmatmul.mubr.msk.f32.vlgmr.msra.gmra.mrb[30].mxu0 %vm107_vm0, %v2531_v30 }
 0xdb5   :  { %v3219_v43 = vpop.f32.mrb[30].mxu0 }
 0xdb6   :  { %v2619_v61 = vadd.f32 %v3219_v43, %v2843_v37  ;;  %v2613_v41 = vpop.f32.mrb[31].mxu0 }
 0xdb7   :  { %v2614_v42 = vadd.f32 %v2843_v37, %v2613_v41 }
 0xdb8   :  { %v2623_v49 = vmax.f32 %v2619_v61, 0.0 }
 0xdb9   :  { %v2622_v47 = vmax.f32 %v2614_v42, 0.0 }
 0xdbb   :  { %3236 = vmatprep.mubr.msk.f32.mxu1 %vm2632_vm8, %v2622_v47 }
 0xdbc   :  { %3237 = vmatmul.mubr.msk.f32.vlgmr.msra.gmra.mrb[18].mxu1 %vm2632_vm8, %v2623_v49 }
 0xe8f   :  { %v3238_v52 = vpop.f32.mrb[18].mxu1 }
 0xe90   :  { %v2715_v27 = vadd.f32 %v3238_v52, %v4213_v3  ;;  %v2705_v28 = vpop.f32.mrb[19].mxu1 }
 0xe91   :  { %v2714_v33 = vadd.f32 %v2705_v28, %v4216_v18 }
 0xe92   :  { %v2722_v40 = vadd.f32 %v2848_v25, %v2715_v27 }
 0xe93   :  { %v2721_v39 = vadd.f32 %v2848_v25, %v2714_v33 }
 0xe94   :  { %2724 = vst.msk [vmem:[#allocation9 + $0x8] sm:$0xff] %vm107_vm0, %v2722_v40 }
 0xe95   :  { %2723 = vst.msk [vmem:[#allocation9] sm:$0xff] %vm107_vm0, %v2721_v39 }
 0xe96   :  { %3576 = shalt.err (!%p3573_p11)
}
 0xe97   :  { %s3577_s8 = scalar_lea.hbm %s4309_s10, 256 }
 0xe98   :  { %p3578_p12 = scmp.ne.s32.totalorder %s4309_s10, %s3577_s8  ;;  %p3581_p13 = scmp.lt.u32.totalorder %s3577_s8, %s4309_s10 }
 0xe9a   :  { %p3583_p0 = pnand %p3581_p13, %p3578_p12 }
 0xe9c   :  { %3586 = shalt.err (!%p3583_p0)
}
 0xe9d   :  { %2736 = dma.vmem_to_hbm [thread:$0]  %s2731_s0, 256, %s4309_s10, [#allocation4], %s3597_s27, %s3597_s27, %s3598_s28  }
 0xe9e   :  { %3593 = dma.done.wait [#allocation4], 256  }
 0xe9f   :  { %3594 = vsyncadd [#allocation4], 4294967040 }
 0xea0   :  { %2740 = vsyncpa [#allocation3], 1 }
 0xea1   :  { %2741 = vsyncpa [#allocation8], 1 }
 0xea2   :  { %2742 = vsyncpa [#allocation4], 1 }
 0xea3   :  { %2743 = vsyncpa [#allocation5], 1 }

</bundles_post_ra>
